<compile_context>
chip_gen: v5e
topology: v5e:2x2
jax: 0.10.0
libtpu: 0.0.40
codegen_flags: <defaults>
</compile_context>

<pallas_src>
import jax
import jax.numpy as jnp
from jax.experimental import pallas as pl
from jax.experimental.pallas import tpu as pltpu

# ----- synthetic "args" consistent with the module's forward -----------------
B       = 2            # batch
S       = 8            # args.max_length
H       = 32           # args.hidden_size (== bert hidden_size)
NH      = 4            # attention heads
HD      = H // NH      # head dim
I       = 64           # FFN intermediate size
L       = 2            # number of encoder layers
VOCAB   = 64           # vocab size
NCLASS  = 3            # classnum
T       = B * S        # total tokens
OUT_PAD = 128          # lane-padded classifier output width


# ----------------------------- math helpers ----------------------------------
def _ln(x, g, b, eps=1e-12):
    mu = jnp.mean(x, axis=-1, keepdims=True)
    var = jnp.mean((x - mu) * (x - mu), axis=-1, keepdims=True)
    return (x - mu) * jax.lax.rsqrt(var + eps) * g + b


def _gelu(x):
    # tanh-approx GELU (EUP tanh; keeps VALU free)
    return 0.5 * x * (1.0 + jnp.tanh(0.7978845608028654 * (x + 0.044715 * x * x * x)))


# -------------------------------- kernel --------------------------------------
def fused_forward_kernel(x_ref, mask_ref, embln_ref,
                         wq_ref, bq_ref, wkv_ref, bkv_ref, wo_ref,
                         w1_ref, b1f_ref, w2_ref, vec_ref,
                         cw1_ref, cb1_ref, cw2_ref, cb2_ref,
                         out_ref, flat_ref):
    """Whole TargetNet forward.  x: (B*S, H) f32, mask: (B*S, B*S) additive f32."""
    # --- embedding LayerNorm ---
    x = _ln(x_ref[...], embln_ref[0:1, :], embln_ref[1:2, :])          # (T, H) f32
    mask = mask_ref[...]                                               # (T, T) f32

    # --- encoder layers (static unroll, L=2) ---
    for l in range(L):
        x_bf = x.astype(jnp.bfloat16)

        # K^T / V^T for all heads in ONE matmul, already in (feature, token) layout:
        #   kvT[j, t] = sum_i wkvT[j, i] * x[t, i]            -> (2H, T)
        kvT = jax.lax.dot_general(wkv_ref[l], x_bf,
                                  (((1,), (1,)), ((), ())),
                                  preferred_element_type=jnp.float32) + bkv_ref[l]
        kvT_bf = kvT.astype(jnp.bfloat16)
        wo_l = wo_ref[l]                                               # (H, H) bf16

        attn = None
        for h in range(NH):                                            # static unroll, NH=4
            # Q for head h (scale folded into weights): (T, HD)
            q_h = (jnp.dot(x_bf, wq_ref[l, h],
                           preferred_element_type=jnp.float32) + bq_ref[l, h])
            kT_h = kvT_bf[h * HD:(h + 1) * HD, :]                      # (HD, T) sublane slice
            vT_h = kvT_bf[H + h * HD:H + (h + 1) * HD, :]              # (HD, T) sublane slice

            # scores over ALL tokens; cross-batch + padded keys are masked additively
            s = jnp.dot(q_h.astype(jnp.bfloat16), kT_h,
                        preferred_element_type=jnp.float32) + mask     # (T, T)
            m = jnp.max(s, axis=-1, keepdims=True)
            e = jnp.exp(s - m)
            p = e * pl.reciprocal(jnp.sum(e, axis=-1, keepdims=True), approx=True)

            # context: ctx[t, d] = sum_u p[t, u] * v[u, d]             -> (T, HD)
            ctx_h = jax.lax.dot_general(p.astype(jnp.bfloat16), vT_h,
                                        (((1,), (1,)), ((), ())),
                                        preferred_element_type=jnp.float32)
            # per-head output projection (sums to ctx @ Wo); avoids lane concatenation
            contrib = jnp.dot(ctx_h.astype(jnp.bfloat16),
                              wo_l[h * HD:(h + 1) * HD, :],
                              preferred_element_type=jnp.float32)      # (T, H)
            attn = contrib if attn is None else attn + contrib

        vec = vec_ref[l]                                               # (6, H): bo, bf2, g1, b1, g2, b2
        h1 = _ln(x + attn + vec[0:1, :], vec[2:3, :], vec[3:4, :])

        ff1 = jnp.dot(h1.astype(jnp.bfloat16), w1_ref[l],
                      preferred_element_type=jnp.float32) + b1f_ref[l]
        ff2 = jnp.dot(_gelu(ff1).astype(jnp.bfloat16), w2_ref[l],
                      preferred_element_type=jnp.float32) + vec[1:2, :]
        x = _ln(h1 + ff2, vec[4:5, :], vec[5:6, :])

    # --- bert_output.view(B, -1): in-kernel flatten into VMEM scratch (static slices) ---
    for b in range(B):
        for s in range(S):
            flat_ref[b:b + 1, s * H:(s + 1) * H] = x[b * S + s: b * S + s + 1, :]

    # --- classifier: Linear(S*H -> H) then Linear(H -> classnum, lane-padded dense store) ---
    hcls = jnp.dot(flat_ref[...].astype(jnp.bfloat16), cw1_ref[...],
                   preferred_element_type=jnp.float32) + cb1_ref[...]
    out_ref[...] = jnp.dot(hcls.astype(jnp.bfloat16), cw2_ref[...],
                           preferred_element_type=jnp.float32) + cb2_ref[...]


# ------------------------------ parameters ------------------------------------
def init_params(key):
    ks = iter(jax.random.split(key, 32))

    def nrm(shape, std=0.02):
        return jax.random.normal(next(ks), shape, jnp.float32) * std

    scale = 1.0 / (HD ** 0.5)
    w_q_h, b_q_h, w_kvT, b_kvT, wo, w1, bf1, w2, vecs = ([] for _ in range(9))
    for _ in range(L):
        wq = nrm((H, H)) * scale                       # fold 1/sqrt(HD) into Q weights
        wk = nrm((H, H))
        wv = nrm((H, H))
        wol = nrm((H, H))
        w_q_h.append(wq.reshape(H, NH, HD).transpose(1, 0, 2))     # (NH, H, HD)
        b_q_h.append(jnp.zeros((NH, 1, HD), jnp.float32))          # scaled Q bias (zeros)
        w_kvT.append(jnp.concatenate([wk.T, wv.T], axis=0))        # (2H, H)
        b_kvT.append(jnp.zeros((2 * H, 1), jnp.float32))
        wo.append(wol)
        w1.append(nrm((H, I)))
        bf1.append(jnp.zeros((1, I), jnp.float32))
        w2.append(nrm((I, H)))
        vecs.append(jnp.stack([jnp.zeros(H), jnp.zeros(H),         # bo, bf2
                               jnp.ones(H), jnp.zeros(H),          # ln1 gamma/beta
                               jnp.ones(H), jnp.zeros(H)]))        # ln2 gamma/beta

    bf16 = jnp.bfloat16
    return {
        # embedding tables (gathers done in the JAX wrapper)
        "word_emb": nrm((VOCAB, H)),
        "pos_emb": nrm((S, H)),
        "type_emb": nrm((2, H)),                       # re-initialized 2-row token_type table
        "emb_ln": jnp.stack([jnp.ones(H), jnp.zeros(H)]).astype(jnp.float32),
        # encoder (stacked over layers, MXU operands in bf16)
        "w_q_h": jnp.stack(w_q_h).astype(bf16),        # (L, NH, H, HD)
        "b_q_h": jnp.stack(b_q_h),                     # (L, NH, 1, HD) f32
        "w_kvT": jnp.stack(w_kvT).astype(bf16),        # (L, 2H, H)
        "b_kvT": jnp.stack(b_kvT),                     # (L, 2H, 1) f32
        "wo": jnp.stack(wo).astype(bf16),              # (L, H, H)
        "w1": jnp.stack(w1).astype(bf16),              # (L, H, I)
        "bf1": jnp.stack(bf1),                         # (L, 1, I) f32
        "w2": jnp.stack(w2).astype(bf16),              # (L, I, H)
        "vecs": jnp.stack(vecs).astype(jnp.float32),   # (L, 6, H) f32
        # classifier: Linear(S*H -> H), Linear(H -> classnum) padded to 128 lanes
        "cls_w1": nrm((S * H, H)).astype(bf16),
        "cls_b1": jnp.zeros((1, H), jnp.float32),
        "cls_w2p": jnp.pad(nrm((H, NCLASS)), ((0, 0), (0, OUT_PAD - NCLASS))).astype(bf16),
        "cls_b2p": jnp.zeros((1, OUT_PAD), jnp.float32),
    }


# -------------------------------- forward --------------------------------------
@jax.jit
def target_net_forward(params, input_ids, token_type_ids, attention_mask, label):
    del label  # forward only returns {'last_output': ...}

    # --- BERT embeddings (gather = glue, stays in JAX) ---
    emb = (params["word_emb"][input_ids]
           + params["pos_emb"][None, :, :]
           + params["type_emb"][token_type_ids]).astype(jnp.float32)   # (B, S, H)
    x_emb = emb.reshape(T, H)

    # --- block-diagonal additive key mask over all B*S tokens ---
    row_b = jnp.repeat(jnp.arange(B, dtype=jnp.int32), S)              # batch id per row
    same = row_b[:, None] == row_b[None, :]
    kvalid = attention_mask.reshape(T) > 0
    addmask = jnp.where(same & kvalid[None, :], 0.0, -1e9).astype(jnp.float32)

    out_pad = pl.pallas_call(
        fused_forward_kernel,
        out_shape=jax.ShapeDtypeStruct((B, OUT_PAD), jnp.float32),
        scratch_shapes=[pltpu.VMEM((B, S * H), jnp.float32)],          # flatten buffer
    )(x_emb, addmask, params["emb_ln"],
      params["w_q_h"], params["b_q_h"], params["w_kvT"], params["b_kvT"],
      params["wo"], params["w1"], params["bf1"], params["w2"], params["vecs"],
      params["cls_w1"], params["cls_b1"], params["cls_w2p"], params["cls_b2p"])

    return {"last_output": out_pad[:, :NCLASS]}


# -------------------------- pure-JAX reference ----------------------------------
def reference_forward(params, input_ids, token_type_ids, attention_mask):
    f32 = jnp.float32
    emb = (params["word_emb"][input_ids] + params["pos_emb"][None]
           + params["type_emb"][token_type_ids]).astype(f32)           # (B, S, H)
    x = _ln(emb, params["emb_ln"][0], params["emb_ln"][1])
    keymask = (1.0 - attention_mask.astype(f32)) * -1e9                # (B, S)

    for l in range(L):
        wq = params["w_q_h"][l].astype(f32)            # (NH, H, HD), scale folded
        bq = params["b_q_h"][l].astype(f32)            # (NH, 1, HD)
        wkvT = params["w_kvT"][l].astype(f32)          # (2H, H)
        bkv = params["b_kvT"][l].astype(f32)[:, 0]     # (2H,)
        wo = params["wo"][l].astype(f32)
        w1 = params["w1"][l].astype(f32)
        b1 = params["bf1"][l].astype(f32)
        w2 = params["w2"][l].astype(f32)
        bo, bf2, g1, be1, g2, be2 = [params["vecs"][l, i] for i in range(6)]

        q = jnp.einsum('bsd,hdk->bhsk', x, wq) + bq[None, :, :, :]     # (B, NH, S, HD)
        kv = jnp.einsum('bsd,ed->bse', x, wkvT) + bkv                  # (B, S, 2H)
        k = kv[..., :H].reshape(B, S, NH, HD).transpose(0, 2, 1, 3)
        v = kv[..., H:].reshape(B, S, NH, HD).transpose(0, 2, 1, 3)
        s = jnp.einsum('bhsk,bhtk->bhst', q, k) + keymask[:, None, None, :]
        p = jax.nn.softmax(s, axis=-1)
        ctx = jnp.einsum('bhst,bhtk->bhsk', p, v)
        ctx = ctx.transpose(0, 2, 1, 3).reshape(B, S, H)
        attn = ctx @ wo + bo
        h1 = _ln(x + attn, g1, be1)
        ff = _gelu(h1 @ w1 + b1) @ w2 + bf2
        x = _ln(h1 + ff, g2, be2)

    flat = x.reshape(B, S * H)
    hcls = flat @ params["cls_w1"].astype(f32) + params["cls_b1"]
    out = hcls @ params["cls_w2p"].astype(f32) + params["cls_b2p"]
    return out[:, :NCLASS]


# --------------------------------- main ------------------------------------------
if __name__ == "__main__":
    key = jax.random.PRNGKey(0)
    pkey, ikey, tkey = jax.random.split(key, 3)

    params = init_params(pkey)
    input_ids = jax.random.randint(ikey, (B, S), 0, VOCAB, dtype=jnp.int32)
    token_type_ids = jax.random.randint(tkey, (B, S), 0, 2, dtype=jnp.int32)
    attention_mask = jnp.ones((B, S), jnp.int32).at[:, S - 2:].set(0)  # last 2 tokens padded
    label = jnp.zeros((B,), jnp.int32)

    out = target_net_forward(params, input_ids, token_type_ids, attention_mask, label)
    got = jax.block_until_ready(out["last_output"])
    assert got.shape == (B, NCLASS)

    ref = reference_forward(params, input_ids, token_type_ids, attention_mask)
    err = float(jnp.max(jnp.abs(got - ref)))
    assert err < 3e-2, f"kernel vs reference max abs err = {err}"

    print("KERNEL_OK")
</pallas_src>

<mosaic_0001>
module attributes {stable_mosaic.version = 11 : i64} {
  func.func @fused_forward_kernel(%arg0: memref<16x32xf32, #tpu.memory_space<vmem>>, %arg1: memref<16x16xf32, #tpu.memory_space<vmem>>, %arg2: memref<2x32xf32, #tpu.memory_space<vmem>>, %arg3: memref<2x4x32x8xbf16, #tpu.memory_space<vmem>>, %arg4: memref<2x4x1x8xf32, #tpu.memory_space<vmem>>, %arg5: memref<2x64x32xbf16, #tpu.memory_space<vmem>>, %arg6: memref<2x64x1xf32, #tpu.memory_space<vmem>>, %arg7: memref<2x32x32xbf16, #tpu.memory_space<vmem>>, %arg8: memref<2x32x64xbf16, #tpu.memory_space<vmem>>, %arg9: memref<2x1x64xf32, #tpu.memory_space<vmem>>, %arg10: memref<2x64x32xbf16, #tpu.memory_space<vmem>>, %arg11: memref<2x6x32xf32, #tpu.memory_space<vmem>>, %arg12: memref<256x32xbf16, #tpu.memory_space<vmem>>, %arg13: memref<1x32xf32, #tpu.memory_space<vmem>>, %arg14: memref<32x128xbf16, #tpu.memory_space<vmem>>, %arg15: memref<1x128xf32, #tpu.memory_space<vmem>>, %arg16: memref<2x128xf32, #tpu.memory_space<vmem>>, %arg17: memref<2x256xf32, #tpu.memory_space<vmem>>) attributes {dimension_semantics = [], scalar_prefetch = 0 : i64, scratch_operands = 1 : i64, tpu.core_type = #tpu.core_type<tc>} {
    %c0 = arith.constant 0 : index
    %c0_0 = arith.constant 0 : index
    %0 = vector.load %arg0[%c0, %c0_0] : memref<16x32xf32, #tpu.memory_space<vmem>>, vector<16x32xf32>
    %c0_1 = arith.constant 0 : index
    %c0_2 = arith.constant 0 : index
    %1 = vector.load %arg2[%c0_1, %c0_2] : memref<2x32xf32, #tpu.memory_space<vmem>>, vector<1x32xf32>
    %c1 = arith.constant 1 : index
    %c0_3 = arith.constant 0 : index
    %2 = vector.load %arg2[%c1, %c0_3] : memref<2x32xf32, #tpu.memory_space<vmem>>, vector<1x32xf32>
    %cst = arith.constant dense<0.000000e+00> : vector<16xf32>
    %3 = vector.multi_reduction <add>, %0, %cst [1] : vector<16x32xf32> to vector<16xf32>
    %4 = vector.shape_cast %3 : vector<16xf32> to vector<16x1xf32>
    %cst_4 = arith.constant 3.200000e+01 : f32
    %5 = vector.broadcast %cst_4 : f32 to vector<16x1xf32>
    %6 = arith.divf %4, %5 : vector<16x1xf32>
    %7 = vector.broadcast %6 : vector<16x1xf32> to vector<16x32xf32>
    %8 = arith.subf %0, %7 : vector<16x32xf32>
    %9 = vector.broadcast %6 : vector<16x1xf32> to vector<16x32xf32>
    %10 = arith.subf %0, %9 : vector<16x32xf32>
    %11 = arith.mulf %8, %10 : vector<16x32xf32>
    %cst_5 = arith.constant dense<0.000000e+00> : vector<16xf32>
    %12 = vector.multi_reduction <add>, %11, %cst_5 [1] : vector<16x32xf32> to vector<16xf32>
    %13 = vector.shape_cast %12 : vector<16xf32> to vector<16x1xf32>
    %cst_6 = arith.constant 3.200000e+01 : f32
    %14 = vector.broadcast %cst_6 : f32 to vector<16x1xf32>
    %15 = arith.divf %13, %14 : vector<16x1xf32>
    %16 = vector.broadcast %6 : vector<16x1xf32> to vector<16x32xf32>
    %17 = arith.subf %0, %16 : vector<16x32xf32>
    %cst_7 = arith.constant 9.99999996E-13 : f32
    %18 = vector.broadcast %cst_7 : f32 to vector<16x1xf32>
    %19 = arith.addf %15, %18 : vector<16x1xf32>
    %20 = math.rsqrt %19 : vector<16x1xf32>
    %21 = vector.broadcast %20 : vector<16x1xf32> to vector<16x32xf32>
    %22 = arith.mulf %17, %21 : vector<16x32xf32>
    %23 = vector.broadcast %1 : vector<1x32xf32> to vector<16x32xf32>
    %24 = arith.mulf %22, %23 : vector<16x32xf32>
    %25 = vector.broadcast %2 : vector<1x32xf32> to vector<16x32xf32>
    %26 = arith.addf %24, %25 : vector<16x32xf32>
    %c0_8 = arith.constant 0 : index
    %c0_9 = arith.constant 0 : index
    %27 = vector.load %arg1[%c0_8, %c0_9] : memref<16x16xf32, #tpu.memory_space<vmem>>, vector<16x16xf32>
    %28 = arith.truncf %26 : vector<16x32xf32> to vector<16x32xbf16>
    %c0_10 = arith.constant 0 : index
    %c0_11 = arith.constant 0 : index
    %c0_12 = arith.constant 0 : index
    %29 = vector.load %arg5[%c0_10, %c0_11, %c0_12] : memref<2x64x32xbf16, #tpu.memory_space<vmem>>, vector<1x64x32xbf16>
    %30 = vector.shape_cast %29 : vector<1x64x32xbf16> to vector<64x32xbf16>
    %cst_13 = arith.constant dense<0.000000e+00> : vector<64x16xf32>
    %31 = tpu.matmul %30, %28, %cst_13 {dimension_numbers = #tpu.dot_dimension_numbers<[1], [1], [0], [0], [0, 0, 1, 0], [], []>} : vector<64x32xbf16>, vector<16x32xbf16>, vector<64x16xf32> -> vector<64x16xf32>
    %c0_14 = arith.constant 0 : index
    %c0_15 = arith.constant 0 : index
    %c0_16 = arith.constant 0 : index
    %32 = vector.load %arg6[%c0_14, %c0_15, %c0_16] : memref<2x64x1xf32, #tpu.memory_space<vmem>>, vector<1x64x1xf32>
    %33 = vector.shape_cast %32 : vector<1x64x1xf32> to vector<64x1xf32>
    %34 = vector.broadcast %33 : vector<64x1xf32> to vector<64x16xf32>
    %35 = arith.addf %31, %34 : vector<64x16xf32>
    %36 = arith.truncf %35 : vector<64x16xf32> to vector<64x16xbf16>
    %c0_17 = arith.constant 0 : index
    %c0_18 = arith.constant 0 : index
    %c0_19 = arith.constant 0 : index
    %37 = vector.load %arg7[%c0_17, %c0_18, %c0_19] : memref<2x32x32xbf16, #tpu.memory_space<vmem>>, vector<1x32x32xbf16>
    %38 = vector.shape_cast %37 : vector<1x32x32xbf16> to vector<32x32xbf16>
    %c0_20 = arith.constant 0 : index
    %c0_21 = arith.constant 0 : index
    %c0_22 = arith.constant 0 : index
    %c0_23 = arith.constant 0 : index
    %39 = vector.load %arg3[%c0_20, %c0_21, %c0_22, %c0_23] : memref<2x4x32x8xbf16, #tpu.memory_space<vmem>>, vector<1x1x32x8xbf16>
    %40 = vector.shape_cast %39 : vector<1x1x32x8xbf16> to vector<32x8xbf16>
    %cst_24 = arith.constant dense<0.000000e+00> : vector<16x8xf32>
    %41 = tpu.matmul %28, %40, %cst_24 {dimension_numbers = #tpu.dot_dimension_numbers<[1], [0], [0], [1], [0, 0, 1, 1], [], []>} : vector<16x32xbf16>, vector<32x8xbf16>, vector<16x8xf32> -> vector<16x8xf32>
    %c0_25 = arith.constant 0 : index
    %c0_26 = arith.constant 0 : index
    %c0_27 = arith.constant 0 : index
    %c0_28 = arith.constant 0 : index
    %42 = vector.load %arg4[%c0_25, %c0_26, %c0_27, %c0_28] : memref<2x4x1x8xf32, #tpu.memory_space<vmem>>, vector<1x1x1x8xf32>
    %43 = vector.shape_cast %42 : vector<1x1x1x8xf32> to vector<1x8xf32>
    %44 = vector.broadcast %43 : vector<1x8xf32> to vector<16x8xf32>
    %45 = arith.addf %41, %44 : vector<16x8xf32>
    %46 = vector.extract_strided_slice %36 {offsets = [0, 0], sizes = [8, 16], strides = [1, 1]} : vector<64x16xbf16> to vector<8x16xbf16>
    %47 = vector.extract_strided_slice %36 {offsets = [32, 0], sizes = [8, 16], strides = [1, 1]} : vector<64x16xbf16> to vector<8x16xbf16>
    %48 = arith.truncf %45 : vector<16x8xf32> to vector<16x8xbf16>
    %cst_29 = arith.constant dense<0.000000e+00> : vector<16x16xf32>
    %49 = tpu.matmul %48, %46, %cst_29 {dimension_numbers = #tpu.dot_dimension_numbers<[1], [0], [0], [1], [0, 0, 1, 1], [], []>} : vector<16x8xbf16>, vector<8x16xbf16>, vector<16x16xf32> -> vector<16x16xf32>
    %50 = arith.addf %49, %27 : vector<16x16xf32>
    %cst_30 = arith.constant dense<0xFF800000> : vector<16xf32>
    %51 = vector.multi_reduction <maximumf>, %50, %cst_30 [1] : vector<16x16xf32> to vector<16xf32>
    %52 = vector.shape_cast %51 : vector<16xf32> to vector<16x1xf32>
    %53 = vector.broadcast %52 : vector<16x1xf32> to vector<16x16xf32>
    %54 = arith.subf %50, %53 : vector<16x16xf32>
    %55 = math.exp %54 : vector<16x16xf32>
    %cst_31 = arith.constant dense<0.000000e+00> : vector<16xf32>
    %56 = vector.multi_reduction <add>, %55, %cst_31 [1] : vector<16x16xf32> to vector<16xf32>
    %57 = vector.shape_cast %56 : vector<16xf32> to vector<16x1xf32>
    %58 = tpu.reciprocal %57 {approx = true} : vector<16x1xf32> -> vector<16x1xf32>
    %59 = vector.broadcast %58 : vector<16x1xf32> to vector<16x16xf32>
    %60 = arith.mulf %55, %59 : vector<16x16xf32>
    %61 = arith.truncf %60 : vector<16x16xf32> to vector<16x16xbf16>
    %cst_32 = arith.constant dense<0.000000e+00> : vector<16x8xf32>
    %62 = tpu.matmul %61, %47, %cst_32 {dimension_numbers = #tpu.dot_dimension_numbers<[1], [1], [0], [0], [0, 0, 1, 0], [], []>} : vector<16x16xbf16>, vector<8x16xbf16>, vector<16x8xf32> -> vector<16x8xf32>
    %63 = arith.truncf %62 : vector<16x8xf32> to vector<16x8xbf16>
    %64 = vector.extract_strided_slice %38 {offsets = [0, 0], sizes = [8, 32], strides = [1, 1]} : vector<32x32xbf16> to vector<8x32xbf16>
    %cst_33 = arith.constant dense<0.000000e+00> : vector<16x32xf32>
    %65 = tpu.matmul %63, %64, %cst_33 {dimension_numbers = #tpu.dot_dimension_numbers<[1], [0], [0], [1], [0, 0, 1, 1], [], []>} : vector<16x8xbf16>, vector<8x32xbf16>, vector<16x32xf32> -> vector<16x32xf32>
    %c0_34 = arith.constant 0 : index
    %c1_35 = arith.constant 1 : index
    %c0_36 = arith.constant 0 : index
    %c0_37 = arith.constant 0 : index
    %66 = vector.load %arg3[%c0_34, %c1_35, %c0_36, %c0_37] : memref<2x4x32x8xbf16, #tpu.memory_space<vmem>>, vector<1x1x32x8xbf16>
    %67 = vector.shape_cast %66 : vector<1x1x32x8xbf16> to vector<32x8xbf16>
    %cst_38 = arith.constant dense<0.000000e+00> : vector<16x8xf32>
    %68 = tpu.matmul %28, %67, %cst_38 {dimension_numbers = #tpu.dot_dimension_numbers<[1], [0], [0], [1], [0, 0, 1, 1], [], []>} : vector<16x32xbf16>, vector<32x8xbf16>, vector<16x8xf32> -> vector<16x8xf32>
    %c0_39 = arith.constant 0 : index
    %c1_40 = arith.constant 1 : index
    %c0_41 = arith.constant 0 : index
    %c0_42 = arith.constant 0 : index
    %69 = vector.load %arg4[%c0_39, %c1_40, %c0_41, %c0_42] : memref<2x4x1x8xf32, #tpu.memory_space<vmem>>, vector<1x1x1x8xf32>
    %70 = vector.shape_cast %69 : vector<1x1x1x8xf32> to vector<1x8xf32>
    %71 = vector.broadcast %70 : vector<1x8xf32> to vector<16x8xf32>
    %72 = arith.addf %68, %71 : vector<16x8xf32>
    %73 = vector.extract_strided_slice %36 {offsets = [8, 0], sizes = [8, 16], strides = [1, 1]} : vector<64x16xbf16> to vector<8x16xbf16>
    %74 = vector.extract_strided_slice %36 {offsets = [40, 0], sizes = [8, 16], strides = [1, 1]} : vector<64x16xbf16> to vector<8x16xbf16>
    %75 = arith.truncf %72 : vector<16x8xf32> to vector<16x8xbf16>
    %cst_43 = arith.constant dense<0.000000e+00> : vector<16x16xf32>
    %76 = tpu.matmul %75, %73, %cst_43 {dimension_numbers = #tpu.dot_dimension_numbers<[1], [0], [0], [1], [0, 0, 1, 1], [], []>} : vector<16x8xbf16>, vector<8x16xbf16>, vector<16x16xf32> -> vector<16x16xf32>
    %77 = arith.addf %76, %27 : vector<16x16xf32>
    %cst_44 = arith.constant dense<0xFF800000> : vector<16xf32>
    %78 = vector.multi_reduction <maximumf>, %77, %cst_44 [1] : vector<16x16xf32> to vector<16xf32>
    %79 = vector.shape_cast %78 : vector<16xf32> to vector<16x1xf32>
    %80 = vector.broadcast %79 : vector<16x1xf32> to vector<16x16xf32>
    %81 = arith.subf %77, %80 : vector<16x16xf32>
    %82 = math.exp %81 : vector<16x16xf32>
    %cst_45 = arith.constant dense<0.000000e+00> : vector<16xf32>
    %83 = vector.multi_reduction <add>, %82, %cst_45 [1] : vector<16x16xf32> to vector<16xf32>
    %84 = vector.shape_cast %83 : vector<16xf32> to vector<16x1xf32>
    %85 = tpu.reciprocal %84 {approx = true} : vector<16x1xf32> -> vector<16x1xf32>
    %86 = vector.broadcast %85 : vector<16x1xf32> to vector<16x16xf32>
    %87 = arith.mulf %82, %86 : vector<16x16xf32>
    %88 = arith.truncf %87 : vector<16x16xf32> to vector<16x16xbf16>
    %cst_46 = arith.constant dense<0.000000e+00> : vector<16x8xf32>
    %89 = tpu.matmul %88, %74, %cst_46 {dimension_numbers = #tpu.dot_dimension_numbers<[1], [1], [0], [0], [0, 0, 1, 0], [], []>} : vector<16x16xbf16>, vector<8x16xbf16>, vector<16x8xf32> -> vector<16x8xf32>
    %90 = arith.truncf %89 : vector<16x8xf32> to vector<16x8xbf16>
    %91 = vector.extract_strided_slice %38 {offsets = [8, 0], sizes = [8, 32], strides = [1, 1]} : vector<32x32xbf16> to vector<8x32xbf16>
    %cst_47 = arith.constant dense<0.000000e+00> : vector<16x32xf32>
    %92 = tpu.matmul %90, %91, %cst_47 {dimension_numbers = #tpu.dot_dimension_numbers<[1], [0], [0], [1], [0, 0, 1, 1], [], []>} : vector<16x8xbf16>, vector<8x32xbf16>, vector<16x32xf32> -> vector<16x32xf32>
    %93 = arith.addf %65, %92 : vector<16x32xf32>
    %c0_48 = arith.constant 0 : index
    %c2 = arith.constant 2 : index
    %c0_49 = arith.constant 0 : index
    %c0_50 = arith.constant 0 : index
    %94 = vector.load %arg3[%c0_48, %c2, %c0_49, %c0_50] : memref<2x4x32x8xbf16, #tpu.memory_space<vmem>>, vector<1x1x32x8xbf16>
    %95 = vector.shape_cast %94 : vector<1x1x32x8xbf16> to vector<32x8xbf16>
    %cst_51 = arith.constant dense<0.000000e+00> : vector<16x8xf32>
    %96 = tpu.matmul %28, %95, %cst_51 {dimension_numbers = #tpu.dot_dimension_numbers<[1], [0], [0], [1], [0, 0, 1, 1], [], []>} : vector<16x32xbf16>, vector<32x8xbf16>, vector<16x8xf32> -> vector<16x8xf32>
    %c0_52 = arith.constant 0 : index
    %c2_53 = arith.constant 2 : index
    %c0_54 = arith.constant 0 : index
    %c0_55 = arith.constant 0 : index
    %97 = vector.load %arg4[%c0_52, %c2_53, %c0_54, %c0_55] : memref<2x4x1x8xf32, #tpu.memory_space<vmem>>, vector<1x1x1x8xf32>
    %98 = vector.shape_cast %97 : vector<1x1x1x8xf32> to vector<1x8xf32>
    %99 = vector.broadcast %98 : vector<1x8xf32> to vector<16x8xf32>
    %100 = arith.addf %96, %99 : vector<16x8xf32>
    %101 = vector.extract_strided_slice %36 {offsets = [16, 0], sizes = [8, 16], strides = [1, 1]} : vector<64x16xbf16> to vector<8x16xbf16>
    %102 = vector.extract_strided_slice %36 {offsets = [48, 0], sizes = [8, 16], strides = [1, 1]} : vector<64x16xbf16> to vector<8x16xbf16>
    %103 = arith.truncf %100 : vector<16x8xf32> to vector<16x8xbf16>
    %cst_56 = arith.constant dense<0.000000e+00> : vector<16x16xf32>
    %104 = tpu.matmul %103, %101, %cst_56 {dimension_numbers = #tpu.dot_dimension_numbers<[1], [0], [0], [1], [0, 0, 1, 1], [], []>} : vector<16x8xbf16>, vector<8x16xbf16>, vector<16x16xf32> -> vector<16x16xf32>
    %105 = arith.addf %104, %27 : vector<16x16xf32>
    %cst_57 = arith.constant dense<0xFF800000> : vector<16xf32>
    %106 = vector.multi_reduction <maximumf>, %105, %cst_57 [1] : vector<16x16xf32> to vector<16xf32>
    %107 = vector.shape_cast %106 : vector<16xf32> to vector<16x1xf32>
    %108 = vector.broadcast %107 : vector<16x1xf32> to vector<16x16xf32>
    %109 = arith.subf %105, %108 : vector<16x16xf32>
    %110 = math.exp %109 : vector<16x16xf32>
    %cst_58 = arith.constant dense<0.000000e+00> : vector<16xf32>
    %111 = vector.multi_reduction <add>, %110, %cst_58 [1] : vector<16x16xf32> to vector<16xf32>
    %112 = vector.shape_cast %111 : vector<16xf32> to vector<16x1xf32>
    %113 = tpu.reciprocal %112 {approx = true} : vector<16x1xf32> -> vector<16x1xf32>
    %114 = vector.broadcast %113 : vector<16x1xf32> to vector<16x16xf32>
    %115 = arith.mulf %110, %114 : vector<16x16xf32>
    %116 = arith.truncf %115 : vector<16x16xf32> to vector<16x16xbf16>
    %cst_59 = arith.constant dense<0.000000e+00> : vector<16x8xf32>
    %117 = tpu.matmul %116, %102, %cst_59 {dimension_numbers = #tpu.dot_dimension_numbers<[1], [1], [0], [0], [0, 0, 1, 0], [], []>} : vector<16x16xbf16>, vector<8x16xbf16>, vector<16x8xf32> -> vector<16x8xf32>
    %118 = arith.truncf %117 : vector<16x8xf32> to vector<16x8xbf16>
    %119 = vector.extract_strided_slice %38 {offsets = [16, 0], sizes = [8, 32], strides = [1, 1]} : vector<32x32xbf16> to vector<8x32xbf16>
    %cst_60 = arith.constant dense<0.000000e+00> : vector<16x32xf32>
    %120 = tpu.matmul %118, %119, %cst_60 {dimension_numbers = #tpu.dot_dimension_numbers<[1], [0], [0], [1], [0, 0, 1, 1], [], []>} : vector<16x8xbf16>, vector<8x32xbf16>, vector<16x32xf32> -> vector<16x32xf32>
    %121 = arith.addf %93, %120 : vector<16x32xf32>
    %c0_61 = arith.constant 0 : index
    %c3 = arith.constant 3 : index
    %c0_62 = arith.constant 0 : index
    %c0_63 = arith.constant 0 : index
    %122 = vector.load %arg3[%c0_61, %c3, %c0_62, %c0_63] : memref<2x4x32x8xbf16, #tpu.memory_space<vmem>>, vector<1x1x32x8xbf16>
    %123 = vector.shape_cast %122 : vector<1x1x32x8xbf16> to vector<32x8xbf16>
    %cst_64 = arith.constant dense<0.000000e+00> : vector<16x8xf32>
    %124 = tpu.matmul %28, %123, %cst_64 {dimension_numbers = #tpu.dot_dimension_numbers<[1], [0], [0], [1], [0, 0, 1, 1], [], []>} : vector<16x32xbf16>, vector<32x8xbf16>, vector<16x8xf32> -> vector<16x8xf32>
    %c0_65 = arith.constant 0 : index
    %c3_66 = arith.constant 3 : index
    %c0_67 = arith.constant 0 : index
    %c0_68 = arith.constant 0 : index
    %125 = vector.load %arg4[%c0_65, %c3_66, %c0_67, %c0_68] : memref<2x4x1x8xf32, #tpu.memory_space<vmem>>, vector<1x1x1x8xf32>
    %126 = vector.shape_cast %125 : vector<1x1x1x8xf32> to vector<1x8xf32>
    %127 = vector.broadcast %126 : vector<1x8xf32> to vector<16x8xf32>
    %128 = arith.addf %124, %127 : vector<16x8xf32>
    %129 = vector.extract_strided_slice %36 {offsets = [24, 0], sizes = [8, 16], strides = [1, 1]} : vector<64x16xbf16> to vector<8x16xbf16>
    %130 = vector.extract_strided_slice %36 {offsets = [56, 0], sizes = [8, 16], strides = [1, 1]} : vector<64x16xbf16> to vector<8x16xbf16>
    %131 = arith.truncf %128 : vector<16x8xf32> to vector<16x8xbf16>
    %cst_69 = arith.constant dense<0.000000e+00> : vector<16x16xf32>
    %132 = tpu.matmul %131, %129, %cst_69 {dimension_numbers = #tpu.dot_dimension_numbers<[1], [0], [0], [1], [0, 0, 1, 1], [], []>} : vector<16x8xbf16>, vector<8x16xbf16>, vector<16x16xf32> -> vector<16x16xf32>
    %133 = arith.addf %132, %27 : vector<16x16xf32>
    %cst_70 = arith.constant dense<0xFF800000> : vector<16xf32>
    %134 = vector.multi_reduction <maximumf>, %133, %cst_70 [1] : vector<16x16xf32> to vector<16xf32>
    %135 = vector.shape_cast %134 : vector<16xf32> to vector<16x1xf32>
    %136 = vector.broadcast %135 : vector<16x1xf32> to vector<16x16xf32>
    %137 = arith.subf %133, %136 : vector<16x16xf32>
    %138 = math.exp %137 : vector<16x16xf32>
    %cst_71 = arith.constant dense<0.000000e+00> : vector<16xf32>
    %139 = vector.multi_reduction <add>, %138, %cst_71 [1] : vector<16x16xf32> to vector<16xf32>
    %140 = vector.shape_cast %139 : vector<16xf32> to vector<16x1xf32>
    %141 = tpu.reciprocal %140 {approx = true} : vector<16x1xf32> -> vector<16x1xf32>
    %142 = vector.broadcast %141 : vector<16x1xf32> to vector<16x16xf32>
    %143 = arith.mulf %138, %142 : vector<16x16xf32>
    %144 = arith.truncf %143 : vector<16x16xf32> to vector<16x16xbf16>
    %cst_72 = arith.constant dense<0.000000e+00> : vector<16x8xf32>
    %145 = tpu.matmul %144, %130, %cst_72 {dimension_numbers = #tpu.dot_dimension_numbers<[1], [1], [0], [0], [0, 0, 1, 0], [], []>} : vector<16x16xbf16>, vector<8x16xbf16>, vector<16x8xf32> -> vector<16x8xf32>
    %146 = arith.truncf %145 : vector<16x8xf32> to vector<16x8xbf16>
    %147 = vector.extract_strided_slice %38 {offsets = [24, 0], sizes = [8, 32], strides = [1, 1]} : vector<32x32xbf16> to vector<8x32xbf16>
    %cst_73 = arith.constant dense<0.000000e+00> : vector<16x32xf32>
    %148 = tpu.matmul %146, %147, %cst_73 {dimension_numbers = #tpu.dot_dimension_numbers<[1], [0], [0], [1], [0, 0, 1, 1], [], []>} : vector<16x8xbf16>, vector<8x32xbf16>, vector<16x32xf32> -> vector<16x32xf32>
    %149 = arith.addf %121, %148 : vector<16x32xf32>
    %c0_74 = arith.constant 0 : index
    %c0_75 = arith.constant 0 : index
    %c0_76 = arith.constant 0 : index
    %150 = vector.load %arg11[%c0_74, %c0_75, %c0_76] : memref<2x6x32xf32, #tpu.memory_space<vmem>>, vector<1x6x32xf32>
    %151 = vector.shape_cast %150 : vector<1x6x32xf32> to vector<6x32xf32>
    %152 = arith.addf %26, %149 : vector<16x32xf32>
    %153 = vector.extract_strided_slice %151 {offsets = [0, 0], sizes = [1, 32], strides = [1, 1]} : vector<6x32xf32> to vector<1x32xf32>
    %154 = vector.broadcast %153 : vector<1x32xf32> to vector<16x32xf32>
    %155 = arith.addf %152, %154 : vector<16x32xf32>
    %156 = vector.extract_strided_slice %151 {offsets = [2, 0], sizes = [1, 32], strides = [1, 1]} : vector<6x32xf32> to vector<1x32xf32>
    %157 = vector.extract_strided_slice %151 {offsets = [3, 0], sizes = [1, 32], strides = [1, 1]} : vector<6x32xf32> to vector<1x32xf32>
    %cst_77 = arith.constant dense<0.000000e+00> : vector<16xf32>
    %158 = vector.multi_reduction <add>, %155, %cst_77 [1] : vector<16x32xf32> to vector<16xf32>
    %159 = vector.shape_cast %158 : vector<16xf32> to vector<16x1xf32>
    %cst_78 = arith.constant 3.200000e+01 : f32
    %160 = vector.broadcast %cst_78 : f32 to vector<16x1xf32>
    %161 = arith.divf %159, %160 : vector<16x1xf32>
    %162 = vector.broadcast %161 : vector<16x1xf32> to vector<16x32xf32>
    %163 = arith.subf %155, %162 : vector<16x32xf32>
    %164 = vector.broadcast %161 : vector<16x1xf32> to vector<16x32xf32>
    %165 = arith.subf %155, %164 : vector<16x32xf32>
    %166 = arith.mulf %163, %165 : vector<16x32xf32>
    %cst_79 = arith.constant dense<0.000000e+00> : vector<16xf32>
    %167 = vector.multi_reduction <add>, %166, %cst_79 [1] : vector<16x32xf32> to vector<16xf32>
    %168 = vector.shape_cast %167 : vector<16xf32> to vector<16x1xf32>
    %cst_80 = arith.constant 3.200000e+01 : f32
    %169 = vector.broadcast %cst_80 : f32 to vector<16x1xf32>
    %170 = arith.divf %168, %169 : vector<16x1xf32>
    %171 = vector.broadcast %161 : vector<16x1xf32> to vector<16x32xf32>
    %172 = arith.subf %155, %171 : vector<16x32xf32>
    %cst_81 = arith.constant 9.99999996E-13 : f32
    %173 = vector.broadcast %cst_81 : f32 to vector<16x1xf32>
    %174 = arith.addf %170, %173 : vector<16x1xf32>
    %175 = math.rsqrt %174 : vector<16x1xf32>
    %176 = vector.broadcast %175 : vector<16x1xf32> to vector<16x32xf32>
    %177 = arith.mulf %172, %176 : vector<16x32xf32>
    %178 = vector.broadcast %156 : vector<1x32xf32> to vector<16x32xf32>
    %179 = arith.mulf %177, %178 : vector<16x32xf32>
    %180 = vector.broadcast %157 : vector<1x32xf32> to vector<16x32xf32>
    %181 = arith.addf %179, %180 : vector<16x32xf32>
    %182 = arith.truncf %181 : vector<16x32xf32> to vector<16x32xbf16>
    %c0_82 = arith.constant 0 : index
    %c0_83 = arith.constant 0 : index
    %c0_84 = arith.constant 0 : index
    %183 = vector.load %arg8[%c0_82, %c0_83, %c0_84] : memref<2x32x64xbf16, #tpu.memory_space<vmem>>, vector<1x32x64xbf16>
    %184 = vector.shape_cast %183 : vector<1x32x64xbf16> to vector<32x64xbf16>
    %cst_85 = arith.constant dense<0.000000e+00> : vector<16x64xf32>
    %185 = tpu.matmul %182, %184, %cst_85 {dimension_numbers = #tpu.dot_dimension_numbers<[1], [0], [0], [1], [0, 0, 1, 1], [], []>} : vector<16x32xbf16>, vector<32x64xbf16>, vector<16x64xf32> -> vector<16x64xf32>
    %c0_86 = arith.constant 0 : index
    %c0_87 = arith.constant 0 : index
    %c0_88 = arith.constant 0 : index
    %186 = vector.load %arg9[%c0_86, %c0_87, %c0_88] : memref<2x1x64xf32, #tpu.memory_space<vmem>>, vector<1x1x64xf32>
    %187 = vector.shape_cast %186 : vector<1x1x64xf32> to vector<1x64xf32>
    %188 = vector.broadcast %187 : vector<1x64xf32> to vector<16x64xf32>
    %189 = arith.addf %185, %188 : vector<16x64xf32>
    %cst_89 = arith.constant 5.000000e-01 : f32
    %190 = vector.broadcast %cst_89 : f32 to vector<16x64xf32>
    %191 = arith.mulf %190, %189 : vector<16x64xf32>
    %cst_90 = arith.constant 4.471500e-02 : f32
    %192 = vector.broadcast %cst_90 : f32 to vector<16x64xf32>
    %193 = arith.mulf %192, %189 : vector<16x64xf32>
    %194 = arith.mulf %193, %189 : vector<16x64xf32>
    %195 = arith.mulf %194, %189 : vector<16x64xf32>
    %196 = arith.addf %189, %195 : vector<16x64xf32>
    %cst_91 = arith.constant 0.797884583 : f32
    %197 = vector.broadcast %cst_91 : f32 to vector<16x64xf32>
    %198 = arith.mulf %197, %196 : vector<16x64xf32>
    %199 = math.tanh %198 : vector<16x64xf32>
    %cst_92 = arith.constant 1.000000e+00 : f32
    %200 = vector.broadcast %cst_92 : f32 to vector<16x64xf32>
    %201 = arith.addf %200, %199 : vector<16x64xf32>
    %202 = arith.mulf %191, %201 : vector<16x64xf32>
    %203 = arith.truncf %202 : vector<16x64xf32> to vector<16x64xbf16>
    %c0_93 = arith.constant 0 : index
    %c0_94 = arith.constant 0 : index
    %c0_95 = arith.constant 0 : index
    %204 = vector.load %arg10[%c0_93, %c0_94, %c0_95] : memref<2x64x32xbf16, #tpu.memory_space<vmem>>, vector<1x64x32xbf16>
    %205 = vector.shape_cast %204 : vector<1x64x32xbf16> to vector<64x32xbf16>
    %cst_96 = arith.constant dense<0.000000e+00> : vector<16x32xf32>
    %206 = tpu.matmul %203, %205, %cst_96 {dimension_numbers = #tpu.dot_dimension_numbers<[1], [0], [0], [1], [0, 0, 1, 1], [], []>} : vector<16x64xbf16>, vector<64x32xbf16>, vector<16x32xf32> -> vector<16x32xf32>
    %207 = vector.extract_strided_slice %151 {offsets = [1, 0], sizes = [1, 32], strides = [1, 1]} : vector<6x32xf32> to vector<1x32xf32>
    %208 = vector.broadcast %207 : vector<1x32xf32> to vector<16x32xf32>
    %209 = arith.addf %206, %208 : vector<16x32xf32>
    %210 = arith.addf %181, %209 : vector<16x32xf32>
    %211 = vector.extract_strided_slice %151 {offsets = [4, 0], sizes = [1, 32], strides = [1, 1]} : vector<6x32xf32> to vector<1x32xf32>
    %212 = vector.extract_strided_slice %151 {offsets = [5, 0], sizes = [1, 32], strides = [1, 1]} : vector<6x32xf32> to vector<1x32xf32>
    %cst_97 = arith.constant dense<0.000000e+00> : vector<16xf32>
    %213 = vector.multi_reduction <add>, %210, %cst_97 [1] : vector<16x32xf32> to vector<16xf32>
    %214 = vector.shape_cast %213 : vector<16xf32> to vector<16x1xf32>
    %cst_98 = arith.constant 3.200000e+01 : f32
    %215 = vector.broadcast %cst_98 : f32 to vector<16x1xf32>
    %216 = arith.divf %214, %215 : vector<16x1xf32>
    %217 = vector.broadcast %216 : vector<16x1xf32> to vector<16x32xf32>
    %218 = arith.subf %210, %217 : vector<16x32xf32>
    %219 = vector.broadcast %216 : vector<16x1xf32> to vector<16x32xf32>
    %220 = arith.subf %210, %219 : vector<16x32xf32>
    %221 = arith.mulf %218, %220 : vector<16x32xf32>
    %cst_99 = arith.constant dense<0.000000e+00> : vector<16xf32>
    %222 = vector.multi_reduction <add>, %221, %cst_99 [1] : vector<16x32xf32> to vector<16xf32>
    %223 = vector.shape_cast %222 : vector<16xf32> to vector<16x1xf32>
    %cst_100 = arith.constant 3.200000e+01 : f32
    %224 = vector.broadcast %cst_100 : f32 to vector<16x1xf32>
    %225 = arith.divf %223, %224 : vector<16x1xf32>
    %226 = vector.broadcast %216 : vector<16x1xf32> to vector<16x32xf32>
    %227 = arith.subf %210, %226 : vector<16x32xf32>
    %cst_101 = arith.constant 9.99999996E-13 : f32
    %228 = vector.broadcast %cst_101 : f32 to vector<16x1xf32>
    %229 = arith.addf %225, %228 : vector<16x1xf32>
    %230 = math.rsqrt %229 : vector<16x1xf32>
    %231 = vector.broadcast %230 : vector<16x1xf32> to vector<16x32xf32>
    %232 = arith.mulf %227, %231 : vector<16x32xf32>
    %233 = vector.broadcast %211 : vector<1x32xf32> to vector<16x32xf32>
    %234 = arith.mulf %232, %233 : vector<16x32xf32>
    %235 = vector.broadcast %212 : vector<1x32xf32> to vector<16x32xf32>
    %236 = arith.addf %234, %235 : vector<16x32xf32>
    %237 = arith.truncf %236 : vector<16x32xf32> to vector<16x32xbf16>
    %c1_102 = arith.constant 1 : index
    %c0_103 = arith.constant 0 : index
    %c0_104 = arith.constant 0 : index
    %238 = vector.load %arg5[%c1_102, %c0_103, %c0_104] : memref<2x64x32xbf16, #tpu.memory_space<vmem>>, vector<1x64x32xbf16>
    %239 = vector.shape_cast %238 : vector<1x64x32xbf16> to vector<64x32xbf16>
    %cst_105 = arith.constant dense<0.000000e+00> : vector<64x16xf32>
    %240 = tpu.matmul %239, %237, %cst_105 {dimension_numbers = #tpu.dot_dimension_numbers<[1], [1], [0], [0], [0, 0, 1, 0], [], []>} : vector<64x32xbf16>, vector<16x32xbf16>, vector<64x16xf32> -> vector<64x16xf32>
    %c1_106 = arith.constant 1 : index
    %c0_107 = arith.constant 0 : index
    %c0_108 = arith.constant 0 : index
    %241 = vector.load %arg6[%c1_106, %c0_107, %c0_108] : memref<2x64x1xf32, #tpu.memory_space<vmem>>, vector<1x64x1xf32>
    %242 = vector.shape_cast %241 : vector<1x64x1xf32> to vector<64x1xf32>
    %243 = vector.broadcast %242 : vector<64x1xf32> to vector<64x16xf32>
    %244 = arith.addf %240, %243 : vector<64x16xf32>
    %245 = arith.truncf %244 : vector<64x16xf32> to vector<64x16xbf16>
    %c1_109 = arith.constant 1 : index
    %c0_110 = arith.constant 0 : index
    %c0_111 = arith.constant 0 : index
    %246 = vector.load %arg7[%c1_109, %c0_110, %c0_111] : memref<2x32x32xbf16, #tpu.memory_space<vmem>>, vector<1x32x32xbf16>
    %247 = vector.shape_cast %246 : vector<1x32x32xbf16> to vector<32x32xbf16>
    %c1_112 = arith.constant 1 : index
    %c0_113 = arith.constant 0 : index
    %c0_114 = arith.constant 0 : index
    %c0_115 = arith.constant 0 : index
    %248 = vector.load %arg3[%c1_112, %c0_113, %c0_114, %c0_115] : memref<2x4x32x8xbf16, #tpu.memory_space<vmem>>, vector<1x1x32x8xbf16>
    %249 = vector.shape_cast %248 : vector<1x1x32x8xbf16> to vector<32x8xbf16>
    %cst_116 = arith.constant dense<0.000000e+00> : vector<16x8xf32>
    %250 = tpu.matmul %237, %249, %cst_116 {dimension_numbers = #tpu.dot_dimension_numbers<[1], [0], [0], [1], [0, 0, 1, 1], [], []>} : vector<16x32xbf16>, vector<32x8xbf16>, vector<16x8xf32> -> vector<16x8xf32>
    %c1_117 = arith.constant 1 : index
    %c0_118 = arith.constant 0 : index
    %c0_119 = arith.constant 0 : index
    %c0_120 = arith.constant 0 : index
    %251 = vector.load %arg4[%c1_117, %c0_118, %c0_119, %c0_120] : memref<2x4x1x8xf32, #tpu.memory_space<vmem>>, vector<1x1x1x8xf32>
    %252 = vector.shape_cast %251 : vector<1x1x1x8xf32> to vector<1x8xf32>
    %253 = vector.broadcast %252 : vector<1x8xf32> to vector<16x8xf32>
    %254 = arith.addf %250, %253 : vector<16x8xf32>
    %255 = vector.extract_strided_slice %245 {offsets = [0, 0], sizes = [8, 16], strides = [1, 1]} : vector<64x16xbf16> to vector<8x16xbf16>
    %256 = vector.extract_strided_slice %245 {offsets = [32, 0], sizes = [8, 16], strides = [1, 1]} : vector<64x16xbf16> to vector<8x16xbf16>
    %257 = arith.truncf %254 : vector<16x8xf32> to vector<16x8xbf16>
    %cst_121 = arith.constant dense<0.000000e+00> : vector<16x16xf32>
    %258 = tpu.matmul %257, %255, %cst_121 {dimension_numbers = #tpu.dot_dimension_numbers<[1], [0], [0], [1], [0, 0, 1, 1], [], []>} : vector<16x8xbf16>, vector<8x16xbf16>, vector<16x16xf32> -> vector<16x16xf32>
    %259 = arith.addf %258, %27 : vector<16x16xf32>
    %cst_122 = arith.constant dense<0xFF800000> : vector<16xf32>
    %260 = vector.multi_reduction <maximumf>, %259, %cst_122 [1] : vector<16x16xf32> to vector<16xf32>
    %261 = vector.shape_cast %260 : vector<16xf32> to vector<16x1xf32>
    %262 = vector.broadcast %261 : vector<16x1xf32> to vector<16x16xf32>
    %263 = arith.subf %259, %262 : vector<16x16xf32>
    %264 = math.exp %263 : vector<16x16xf32>
    %cst_123 = arith.constant dense<0.000000e+00> : vector<16xf32>
    %265 = vector.multi_reduction <add>, %264, %cst_123 [1] : vector<16x16xf32> to vector<16xf32>
    %266 = vector.shape_cast %265 : vector<16xf32> to vector<16x1xf32>
    %267 = tpu.reciprocal %266 {approx = true} : vector<16x1xf32> -> vector<16x1xf32>
    %268 = vector.broadcast %267 : vector<16x1xf32> to vector<16x16xf32>
    %269 = arith.mulf %264, %268 : vector<16x16xf32>
    %270 = arith.truncf %269 : vector<16x16xf32> to vector<16x16xbf16>
    %cst_124 = arith.constant dense<0.000000e+00> : vector<16x8xf32>
    %271 = tpu.matmul %270, %256, %cst_124 {dimension_numbers = #tpu.dot_dimension_numbers<[1], [1], [0], [0], [0, 0, 1, 0], [], []>} : vector<16x16xbf16>, vector<8x16xbf16>, vector<16x8xf32> -> vector<16x8xf32>
    %272 = arith.truncf %271 : vector<16x8xf32> to vector<16x8xbf16>
    %273 = vector.extract_strided_slice %247 {offsets = [0, 0], sizes = [8, 32], strides = [1, 1]} : vector<32x32xbf16> to vector<8x32xbf16>
    %cst_125 = arith.constant dense<0.000000e+00> : vector<16x32xf32>
    %274 = tpu.matmul %272, %273, %cst_125 {dimension_numbers = #tpu.dot_dimension_numbers<[1], [0], [0], [1], [0, 0, 1, 1], [], []>} : vector<16x8xbf16>, vector<8x32xbf16>, vector<16x32xf32> -> vector<16x32xf32>
    %c1_126 = arith.constant 1 : index
    %c1_127 = arith.constant 1 : index
    %c0_128 = arith.constant 0 : index
    %c0_129 = arith.constant 0 : index
    %275 = vector.load %arg3[%c1_126, %c1_127, %c0_128, %c0_129] : memref<2x4x32x8xbf16, #tpu.memory_space<vmem>>, vector<1x1x32x8xbf16>
    %276 = vector.shape_cast %275 : vector<1x1x32x8xbf16> to vector<32x8xbf16>
    %cst_130 = arith.constant dense<0.000000e+00> : vector<16x8xf32>
    %277 = tpu.matmul %237, %276, %cst_130 {dimension_numbers = #tpu.dot_dimension_numbers<[1], [0], [0], [1], [0, 0, 1, 1], [], []>} : vector<16x32xbf16>, vector<32x8xbf16>, vector<16x8xf32> -> vector<16x8xf32>
    %c1_131 = arith.constant 1 : index
    %c1_132 = arith.constant 1 : index
    %c0_133 = arith.constant 0 : index
    %c0_134 = arith.constant 0 : index
    %278 = vector.load %arg4[%c1_131, %c1_132, %c0_133, %c0_134] : memref<2x4x1x8xf32, #tpu.memory_space<vmem>>, vector<1x1x1x8xf32>
    %279 = vector.shape_cast %278 : vector<1x1x1x8xf32> to vector<1x8xf32>
    %280 = vector.broadcast %279 : vector<1x8xf32> to vector<16x8xf32>
    %281 = arith.addf %277, %280 : vector<16x8xf32>
    %282 = vector.extract_strided_slice %245 {offsets = [8, 0], sizes = [8, 16], strides = [1, 1]} : vector<64x16xbf16> to vector<8x16xbf16>
    %283 = vector.extract_strided_slice %245 {offsets = [40, 0], sizes = [8, 16], strides = [1, 1]} : vector<64x16xbf16> to vector<8x16xbf16>
    %284 = arith.truncf %281 : vector<16x8xf32> to vector<16x8xbf16>
    %cst_135 = arith.constant dense<0.000000e+00> : vector<16x16xf32>
    %285 = tpu.matmul %284, %282, %cst_135 {dimension_numbers = #tpu.dot_dimension_numbers<[1], [0], [0], [1], [0, 0, 1, 1], [], []>} : vector<16x8xbf16>, vector<8x16xbf16>, vector<16x16xf32> -> vector<16x16xf32>
    %286 = arith.addf %285, %27 : vector<16x16xf32>
    %cst_136 = arith.constant dense<0xFF800000> : vector<16xf32>
    %287 = vector.multi_reduction <maximumf>, %286, %cst_136 [1] : vector<16x16xf32> to vector<16xf32>
    %288 = vector.shape_cast %287 : vector<16xf32> to vector<16x1xf32>
    %289 = vector.broadcast %288 : vector<16x1xf32> to vector<16x16xf32>
    %290 = arith.subf %286, %289 : vector<16x16xf32>
    %291 = math.exp %290 : vector<16x16xf32>
    %cst_137 = arith.constant dense<0.000000e+00> : vector<16xf32>
    %292 = vector.multi_reduction <add>, %291, %cst_137 [1] : vector<16x16xf32> to vector<16xf32>
    %293 = vector.shape_cast %292 : vector<16xf32> to vector<16x1xf32>
    %294 = tpu.reciprocal %293 {approx = true} : vector<16x1xf32> -> vector<16x1xf32>
    %295 = vector.broadcast %294 : vector<16x1xf32> to vector<16x16xf32>
    %296 = arith.mulf %291, %295 : vector<16x16xf32>
    %297 = arith.truncf %296 : vector<16x16xf32> to vector<16x16xbf16>
    %cst_138 = arith.constant dense<0.000000e+00> : vector<16x8xf32>
    %298 = tpu.matmul %297, %283, %cst_138 {dimension_numbers = #tpu.dot_dimension_numbers<[1], [1], [0], [0], [0, 0, 1, 0], [], []>} : vector<16x16xbf16>, vector<8x16xbf16>, vector<16x8xf32> -> vector<16x8xf32>
    %299 = arith.truncf %298 : vector<16x8xf32> to vector<16x8xbf16>
    %300 = vector.extract_strided_slice %247 {offsets = [8, 0], sizes = [8, 32], strides = [1, 1]} : vector<32x32xbf16> to vector<8x32xbf16>
    %cst_139 = arith.constant dense<0.000000e+00> : vector<16x32xf32>
    %301 = tpu.matmul %299, %300, %cst_139 {dimension_numbers = #tpu.dot_dimension_numbers<[1], [0], [0], [1], [0, 0, 1, 1], [], []>} : vector<16x8xbf16>, vector<8x32xbf16>, vector<16x32xf32> -> vector<16x32xf32>
    %302 = arith.addf %274, %301 : vector<16x32xf32>
    %c1_140 = arith.constant 1 : index
    %c2_141 = arith.constant 2 : index
    %c0_142 = arith.constant 0 : index
    %c0_143 = arith.constant 0 : index
    %303 = vector.load %arg3[%c1_140, %c2_141, %c0_142, %c0_143] : memref<2x4x32x8xbf16, #tpu.memory_space<vmem>>, vector<1x1x32x8xbf16>
    %304 = vector.shape_cast %303 : vector<1x1x32x8xbf16> to vector<32x8xbf16>
    %cst_144 = arith.constant dense<0.000000e+00> : vector<16x8xf32>
    %305 = tpu.matmul %237, %304, %cst_144 {dimension_numbers = #tpu.dot_dimension_numbers<[1], [0], [0], [1], [0, 0, 1, 1], [], []>} : vector<16x32xbf16>, vector<32x8xbf16>, vector<16x8xf32> -> vector<16x8xf32>
    %c1_145 = arith.constant 1 : index
    %c2_146 = arith.constant 2 : index
    %c0_147 = arith.constant 0 : index
    %c0_148 = arith.constant 0 : index
    %306 = vector.load %arg4[%c1_145, %c2_146, %c0_147, %c0_148] : memref<2x4x1x8xf32, #tpu.memory_space<vmem>>, vector<1x1x1x8xf32>
    %307 = vector.shape_cast %306 : vector<1x1x1x8xf32> to vector<1x8xf32>
    %308 = vector.broadcast %307 : vector<1x8xf32> to vector<16x8xf32>
    %309 = arith.addf %305, %308 : vector<16x8xf32>
    %310 = vector.extract_strided_slice %245 {offsets = [16, 0], sizes = [8, 16], strides = [1, 1]} : vector<64x16xbf16> to vector<8x16xbf16>
    %311 = vector.extract_strided_slice %245 {offsets = [48, 0], sizes = [8, 16], strides = [1, 1]} : vector<64x16xbf16> to vector<8x16xbf16>
    %312 = arith.truncf %309 : vector<16x8xf32> to vector<16x8xbf16>
    %cst_149 = arith.constant dense<0.000000e+00> : vector<16x16xf32>
    %313 = tpu.matmul %312, %310, %cst_149 {dimension_numbers = #tpu.dot_dimension_numbers<[1], [0], [0], [1], [0, 0, 1, 1], [], []>} : vector<16x8xbf16>, vector<8x16xbf16>, vector<16x16xf32> -> vector<16x16xf32>
    %314 = arith.addf %313, %27 : vector<16x16xf32>
    %cst_150 = arith.constant dense<0xFF800000> : vector<16xf32>
    %315 = vector.multi_reduction <maximumf>, %314, %cst_150 [1] : vector<16x16xf32> to vector<16xf32>
    %316 = vector.shape_cast %315 : vector<16xf32> to vector<16x1xf32>
    %317 = vector.broadcast %316 : vector<16x1xf32> to vector<16x16xf32>
    %318 = arith.subf %314, %317 : vector<16x16xf32>
    %319 = math.exp %318 : vector<16x16xf32>
    %cst_151 = arith.constant dense<0.000000e+00> : vector<16xf32>
    %320 = vector.multi_reduction <add>, %319, %cst_151 [1] : vector<16x16xf32> to vector<16xf32>
    %321 = vector.shape_cast %320 : vector<16xf32> to vector<16x1xf32>
    %322 = tpu.reciprocal %321 {approx = true} : vector<16x1xf32> -> vector<16x1xf32>
    %323 = vector.broadcast %322 : vector<16x1xf32> to vector<16x16xf32>
    %324 = arith.mulf %319, %323 : vector<16x16xf32>
    %325 = arith.truncf %324 : vector<16x16xf32> to vector<16x16xbf16>
    %cst_152 = arith.constant dense<0.000000e+00> : vector<16x8xf32>
    %326 = tpu.matmul %325, %311, %cst_152 {dimension_numbers = #tpu.dot_dimension_numbers<[1], [1], [0], [0], [0, 0, 1, 0], [], []>} : vector<16x16xbf16>, vector<8x16xbf16>, vector<16x8xf32> -> vector<16x8xf32>
    %327 = arith.truncf %326 : vector<16x8xf32> to vector<16x8xbf16>
    %328 = vector.extract_strided_slice %247 {offsets = [16, 0], sizes = [8, 32], strides = [1, 1]} : vector<32x32xbf16> to vector<8x32xbf16>
    %cst_153 = arith.constant dense<0.000000e+00> : vector<16x32xf32>
    %329 = tpu.matmul %327, %328, %cst_153 {dimension_numbers = #tpu.dot_dimension_numbers<[1], [0], [0], [1], [0, 0, 1, 1], [], []>} : vector<16x8xbf16>, vector<8x32xbf16>, vector<16x32xf32> -> vector<16x32xf32>
    %330 = arith.addf %302, %329 : vector<16x32xf32>
    %c1_154 = arith.constant 1 : index
    %c3_155 = arith.constant 3 : index
    %c0_156 = arith.constant 0 : index
    %c0_157 = arith.constant 0 : index
    %331 = vector.load %arg3[%c1_154, %c3_155, %c0_156, %c0_157] : memref<2x4x32x8xbf16, #tpu.memory_space<vmem>>, vector<1x1x32x8xbf16>
    %332 = vector.shape_cast %331 : vector<1x1x32x8xbf16> to vector<32x8xbf16>
    %cst_158 = arith.constant dense<0.000000e+00> : vector<16x8xf32>
    %333 = tpu.matmul %237, %332, %cst_158 {dimension_numbers = #tpu.dot_dimension_numbers<[1], [0], [0], [1], [0, 0, 1, 1], [], []>} : vector<16x32xbf16>, vector<32x8xbf16>, vector<16x8xf32> -> vector<16x8xf32>
    %c1_159 = arith.constant 1 : index
    %c3_160 = arith.constant 3 : index
    %c0_161 = arith.constant 0 : index
    %c0_162 = arith.constant 0 : index
    %334 = vector.load %arg4[%c1_159, %c3_160, %c0_161, %c0_162] : memref<2x4x1x8xf32, #tpu.memory_space<vmem>>, vector<1x1x1x8xf32>
    %335 = vector.shape_cast %334 : vector<1x1x1x8xf32> to vector<1x8xf32>
    %336 = vector.broadcast %335 : vector<1x8xf32> to vector<16x8xf32>
    %337 = arith.addf %333, %336 : vector<16x8xf32>
    %338 = vector.extract_strided_slice %245 {offsets = [24, 0], sizes = [8, 16], strides = [1, 1]} : vector<64x16xbf16> to vector<8x16xbf16>
    %339 = vector.extract_strided_slice %245 {offsets = [56, 0], sizes = [8, 16], strides = [1, 1]} : vector<64x16xbf16> to vector<8x16xbf16>
    %340 = arith.truncf %337 : vector<16x8xf32> to vector<16x8xbf16>
    %cst_163 = arith.constant dense<0.000000e+00> : vector<16x16xf32>
    %341 = tpu.matmul %340, %338, %cst_163 {dimension_numbers = #tpu.dot_dimension_numbers<[1], [0], [0], [1], [0, 0, 1, 1], [], []>} : vector<16x8xbf16>, vector<8x16xbf16>, vector<16x16xf32> -> vector<16x16xf32>
    %342 = arith.addf %341, %27 : vector<16x16xf32>
    %cst_164 = arith.constant dense<0xFF800000> : vector<16xf32>
    %343 = vector.multi_reduction <maximumf>, %342, %cst_164 [1] : vector<16x16xf32> to vector<16xf32>
    %344 = vector.shape_cast %343 : vector<16xf32> to vector<16x1xf32>
    %345 = vector.broadcast %344 : vector<16x1xf32> to vector<16x16xf32>
    %346 = arith.subf %342, %345 : vector<16x16xf32>
    %347 = math.exp %346 : vector<16x16xf32>
    %cst_165 = arith.constant dense<0.000000e+00> : vector<16xf32>
    %348 = vector.multi_reduction <add>, %347, %cst_165 [1] : vector<16x16xf32> to vector<16xf32>
    %349 = vector.shape_cast %348 : vector<16xf32> to vector<16x1xf32>
    %350 = tpu.reciprocal %349 {approx = true} : vector<16x1xf32> -> vector<16x1xf32>
    %351 = vector.broadcast %350 : vector<16x1xf32> to vector<16x16xf32>
    %352 = arith.mulf %347, %351 : vector<16x16xf32>
    %353 = arith.truncf %352 : vector<16x16xf32> to vector<16x16xbf16>
    %cst_166 = arith.constant dense<0.000000e+00> : vector<16x8xf32>
    %354 = tpu.matmul %353, %339, %cst_166 {dimension_numbers = #tpu.dot_dimension_numbers<[1], [1], [0], [0], [0, 0, 1, 0], [], []>} : vector<16x16xbf16>, vector<8x16xbf16>, vector<16x8xf32> -> vector<16x8xf32>
    %355 = arith.truncf %354 : vector<16x8xf32> to vector<16x8xbf16>
    %356 = vector.extract_strided_slice %247 {offsets = [24, 0], sizes = [8, 32], strides = [1, 1]} : vector<32x32xbf16> to vector<8x32xbf16>
    %cst_167 = arith.constant dense<0.000000e+00> : vector<16x32xf32>
    %357 = tpu.matmul %355, %356, %cst_167 {dimension_numbers = #tpu.dot_dimension_numbers<[1], [0], [0], [1], [0, 0, 1, 1], [], []>} : vector<16x8xbf16>, vector<8x32xbf16>, vector<16x32xf32> -> vector<16x32xf32>
    %358 = arith.addf %330, %357 : vector<16x32xf32>
    %c1_168 = arith.constant 1 : index
    %c0_169 = arith.constant 0 : index
    %c0_170 = arith.constant 0 : index
    %359 = vector.load %arg11[%c1_168, %c0_169, %c0_170] : memref<2x6x32xf32, #tpu.memory_space<vmem>>, vector<1x6x32xf32>
    %360 = vector.shape_cast %359 : vector<1x6x32xf32> to vector<6x32xf32>
    %361 = arith.addf %236, %358 : vector<16x32xf32>
    %362 = vector.extract_strided_slice %360 {offsets = [0, 0], sizes = [1, 32], strides = [1, 1]} : vector<6x32xf32> to vector<1x32xf32>
    %363 = vector.broadcast %362 : vector<1x32xf32> to vector<16x32xf32>
    %364 = arith.addf %361, %363 : vector<16x32xf32>
    %365 = vector.extract_strided_slice %360 {offsets = [2, 0], sizes = [1, 32], strides = [1, 1]} : vector<6x32xf32> to vector<1x32xf32>
    %366 = vector.extract_strided_slice %360 {offsets = [3, 0], sizes = [1, 32], strides = [1, 1]} : vector<6x32xf32> to vector<1x32xf32>
    %cst_171 = arith.constant dense<0.000000e+00> : vector<16xf32>
    %367 = vector.multi_reduction <add>, %364, %cst_171 [1] : vector<16x32xf32> to vector<16xf32>
    %368 = vector.shape_cast %367 : vector<16xf32> to vector<16x1xf32>
    %cst_172 = arith.constant 3.200000e+01 : f32
    %369 = vector.broadcast %cst_172 : f32 to vector<16x1xf32>
    %370 = arith.divf %368, %369 : vector<16x1xf32>
    %371 = vector.broadcast %370 : vector<16x1xf32> to vector<16x32xf32>
    %372 = arith.subf %364, %371 : vector<16x32xf32>
    %373 = vector.broadcast %370 : vector<16x1xf32> to vector<16x32xf32>
    %374 = arith.subf %364, %373 : vector<16x32xf32>
    %375 = arith.mulf %372, %374 : vector<16x32xf32>
    %cst_173 = arith.constant dense<0.000000e+00> : vector<16xf32>
    %376 = vector.multi_reduction <add>, %375, %cst_173 [1] : vector<16x32xf32> to vector<16xf32>
    %377 = vector.shape_cast %376 : vector<16xf32> to vector<16x1xf32>
    %cst_174 = arith.constant 3.200000e+01 : f32
    %378 = vector.broadcast %cst_174 : f32 to vector<16x1xf32>
    %379 = arith.divf %377, %378 : vector<16x1xf32>
    %380 = vector.broadcast %370 : vector<16x1xf32> to vector<16x32xf32>
    %381 = arith.subf %364, %380 : vector<16x32xf32>
    %cst_175 = arith.constant 9.99999996E-13 : f32
    %382 = vector.broadcast %cst_175 : f32 to vector<16x1xf32>
    %383 = arith.addf %379, %382 : vector<16x1xf32>
    %384 = math.rsqrt %383 : vector<16x1xf32>
    %385 = vector.broadcast %384 : vector<16x1xf32> to vector<16x32xf32>
    %386 = arith.mulf %381, %385 : vector<16x32xf32>
    %387 = vector.broadcast %365 : vector<1x32xf32> to vector<16x32xf32>
    %388 = arith.mulf %386, %387 : vector<16x32xf32>
    %389 = vector.broadcast %366 : vector<1x32xf32> to vector<16x32xf32>
    %390 = arith.addf %388, %389 : vector<16x32xf32>
    %391 = arith.truncf %390 : vector<16x32xf32> to vector<16x32xbf16>
    %c1_176 = arith.constant 1 : index
    %c0_177 = arith.constant 0 : index
    %c0_178 = arith.constant 0 : index
    %392 = vector.load %arg8[%c1_176, %c0_177, %c0_178] : memref<2x32x64xbf16, #tpu.memory_space<vmem>>, vector<1x32x64xbf16>
    %393 = vector.shape_cast %392 : vector<1x32x64xbf16> to vector<32x64xbf16>
    %cst_179 = arith.constant dense<0.000000e+00> : vector<16x64xf32>
    %394 = tpu.matmul %391, %393, %cst_179 {dimension_numbers = #tpu.dot_dimension_numbers<[1], [0], [0], [1], [0, 0, 1, 1], [], []>} : vector<16x32xbf16>, vector<32x64xbf16>, vector<16x64xf32> -> vector<16x64xf32>
    %c1_180 = arith.constant 1 : index
    %c0_181 = arith.constant 0 : index
    %c0_182 = arith.constant 0 : index
    %395 = vector.load %arg9[%c1_180, %c0_181, %c0_182] : memref<2x1x64xf32, #tpu.memory_space<vmem>>, vector<1x1x64xf32>
    %396 = vector.shape_cast %395 : vector<1x1x64xf32> to vector<1x64xf32>
    %397 = vector.broadcast %396 : vector<1x64xf32> to vector<16x64xf32>
    %398 = arith.addf %394, %397 : vector<16x64xf32>
    %cst_183 = arith.constant 5.000000e-01 : f32
    %399 = vector.broadcast %cst_183 : f32 to vector<16x64xf32>
    %400 = arith.mulf %399, %398 : vector<16x64xf32>
    %cst_184 = arith.constant 4.471500e-02 : f32
    %401 = vector.broadcast %cst_184 : f32 to vector<16x64xf32>
    %402 = arith.mulf %401, %398 : vector<16x64xf32>
    %403 = arith.mulf %402, %398 : vector<16x64xf32>
    %404 = arith.mulf %403, %398 : vector<16x64xf32>
    %405 = arith.addf %398, %404 : vector<16x64xf32>
    %cst_185 = arith.constant 0.797884583 : f32
    %406 = vector.broadcast %cst_185 : f32 to vector<16x64xf32>
    %407 = arith.mulf %406, %405 : vector<16x64xf32>
    %408 = math.tanh %407 : vector<16x64xf32>
    %cst_186 = arith.constant 1.000000e+00 : f32
    %409 = vector.broadcast %cst_186 : f32 to vector<16x64xf32>
    %410 = arith.addf %409, %408 : vector<16x64xf32>
    %411 = arith.mulf %400, %410 : vector<16x64xf32>
    %412 = arith.truncf %411 : vector<16x64xf32> to vector<16x64xbf16>
    %c1_187 = arith.constant 1 : index
    %c0_188 = arith.constant 0 : index
    %c0_189 = arith.constant 0 : index
    %413 = vector.load %arg10[%c1_187, %c0_188, %c0_189] : memref<2x64x32xbf16, #tpu.memory_space<vmem>>, vector<1x64x32xbf16>
    %414 = vector.shape_cast %413 : vector<1x64x32xbf16> to vector<64x32xbf16>
    %cst_190 = arith.constant dense<0.000000e+00> : vector<16x32xf32>
    %415 = tpu.matmul %412, %414, %cst_190 {dimension_numbers = #tpu.dot_dimension_numbers<[1], [0], [0], [1], [0, 0, 1, 1], [], []>} : vector<16x64xbf16>, vector<64x32xbf16>, vector<16x32xf32> -> vector<16x32xf32>
    %416 = vector.extract_strided_slice %360 {offsets = [1, 0], sizes = [1, 32], strides = [1, 1]} : vector<6x32xf32> to vector<1x32xf32>
    %417 = vector.broadcast %416 : vector<1x32xf32> to vector<16x32xf32>
    %418 = arith.addf %415, %417 : vector<16x32xf32>
    %419 = arith.addf %390, %418 : vector<16x32xf32>
    %420 = vector.extract_strided_slice %360 {offsets = [4, 0], sizes = [1, 32], strides = [1, 1]} : vector<6x32xf32> to vector<1x32xf32>
    %421 = vector.extract_strided_slice %360 {offsets = [5, 0], sizes = [1, 32], strides = [1, 1]} : vector<6x32xf32> to vector<1x32xf32>
    %cst_191 = arith.constant dense<0.000000e+00> : vector<16xf32>
    %422 = vector.multi_reduction <add>, %419, %cst_191 [1] : vector<16x32xf32> to vector<16xf32>
    %423 = vector.shape_cast %422 : vector<16xf32> to vector<16x1xf32>
    %cst_192 = arith.constant 3.200000e+01 : f32
    %424 = vector.broadcast %cst_192 : f32 to vector<16x1xf32>
    %425 = arith.divf %423, %424 : vector<16x1xf32>
    %426 = vector.broadcast %425 : vector<16x1xf32> to vector<16x32xf32>
    %427 = arith.subf %419, %426 : vector<16x32xf32>
    %428 = vector.broadcast %425 : vector<16x1xf32> to vector<16x32xf32>
    %429 = arith.subf %419, %428 : vector<16x32xf32>
    %430 = arith.mulf %427, %429 : vector<16x32xf32>
    %cst_193 = arith.constant dense<0.000000e+00> : vector<16xf32>
    %431 = vector.multi_reduction <add>, %430, %cst_193 [1] : vector<16x32xf32> to vector<16xf32>
    %432 = vector.shape_cast %431 : vector<16xf32> to vector<16x1xf32>
    %cst_194 = arith.constant 3.200000e+01 : f32
    %433 = vector.broadcast %cst_194 : f32 to vector<16x1xf32>
    %434 = arith.divf %432, %433 : vector<16x1xf32>
    %435 = vector.broadcast %425 : vector<16x1xf32> to vector<16x32xf32>
    %436 = arith.subf %419, %435 : vector<16x32xf32>
    %cst_195 = arith.constant 9.99999996E-13 : f32
    %437 = vector.broadcast %cst_195 : f32 to vector<16x1xf32>
    %438 = arith.addf %434, %437 : vector<16x1xf32>
    %439 = math.rsqrt %438 : vector<16x1xf32>
    %440 = vector.broadcast %439 : vector<16x1xf32> to vector<16x32xf32>
    %441 = arith.mulf %436, %440 : vector<16x32xf32>
    %442 = vector.broadcast %420 : vector<1x32xf32> to vector<16x32xf32>
    %443 = arith.mulf %441, %442 : vector<16x32xf32>
    %444 = vector.broadcast %421 : vector<1x32xf32> to vector<16x32xf32>
    %445 = arith.addf %443, %444 : vector<16x32xf32>
    %446 = vector.extract_strided_slice %445 {offsets = [0, 0], sizes = [1, 32], strides = [1, 1]} : vector<16x32xf32> to vector<1x32xf32>
    %c0_196 = arith.constant 0 : index
    %c0_197 = arith.constant 0 : index
    %447 = vector.load %arg17[%c0_196, %c0_197] : memref<2x256xf32, #tpu.memory_space<vmem>>, vector<1x32xf32>
    tpu.vector_store %arg17[%c0_196, %c0_197], %446 {strides = array<i32>} : memref<2x256xf32, #tpu.memory_space<vmem>>, vector<1x32xf32>,
    %448 = vector.extract_strided_slice %445 {offsets = [1, 0], sizes = [1, 32], strides = [1, 1]} : vector<16x32xf32> to vector<1x32xf32>
    %c0_198 = arith.constant 0 : index
    %c32 = arith.constant 32 : index
    %449 = vector.load %arg17[%c0_198, %c32] : memref<2x256xf32, #tpu.memory_space<vmem>>, vector<1x32xf32>
    tpu.vector_store %arg17[%c0_198, %c32], %448 {strides = array<i32>} : memref<2x256xf32, #tpu.memory_space<vmem>>, vector<1x32xf32>,
    %450 = vector.extract_strided_slice %445 {offsets = [2, 0], sizes = [1, 32], strides = [1, 1]} : vector<16x32xf32> to vector<1x32xf32>
    %c0_199 = arith.constant 0 : index
    %c64 = arith.constant 64 : index
    %451 = vector.load %arg17[%c0_199, %c64] : memref<2x256xf32, #tpu.memory_space<vmem>>, vector<1x32xf32>
    tpu.vector_store %arg17[%c0_199, %c64], %450 {strides = array<i32>} : memref<2x256xf32, #tpu.memory_space<vmem>>, vector<1x32xf32>,
    %452 = vector.extract_strided_slice %445 {offsets = [3, 0], sizes = [1, 32], strides = [1, 1]} : vector<16x32xf32> to vector<1x32xf32>
    %c0_200 = arith.constant 0 : index
    %c96 = arith.constant 96 : index
    %453 = vector.load %arg17[%c0_200, %c96] : memref<2x256xf32, #tpu.memory_space<vmem>>, vector<1x32xf32>
    tpu.vector_store %arg17[%c0_200, %c96], %452 {strides = array<i32>} : memref<2x256xf32, #tpu.memory_space<vmem>>, vector<1x32xf32>,
    %454 = vector.extract_strided_slice %445 {offsets = [4, 0], sizes = [1, 32], strides = [1, 1]} : vector<16x32xf32> to vector<1x32xf32>
    %c0_201 = arith.constant 0 : index
    %c128 = arith.constant 128 : index
    %455 = vector.load %arg17[%c0_201, %c128] : memref<2x256xf32, #tpu.memory_space<vmem>>, vector<1x32xf32>
    tpu.vector_store %arg17[%c0_201, %c128], %454 {strides = array<i32>} : memref<2x256xf32, #tpu.memory_space<vmem>>, vector<1x32xf32>,
    %456 = vector.extract_strided_slice %445 {offsets = [5, 0], sizes = [1, 32], strides = [1, 1]} : vector<16x32xf32> to vector<1x32xf32>
    %c0_202 = arith.constant 0 : index
    %c160 = arith.constant 160 : index
    %457 = vector.load %arg17[%c0_202, %c160] : memref<2x256xf32, #tpu.memory_space<vmem>>, vector<1x32xf32>
    tpu.vector_store %arg17[%c0_202, %c160], %456 {strides = array<i32>} : memref<2x256xf32, #tpu.memory_space<vmem>>, vector<1x32xf32>,
    %458 = vector.extract_strided_slice %445 {offsets = [6, 0], sizes = [1, 32], strides = [1, 1]} : vector<16x32xf32> to vector<1x32xf32>
    %c0_203 = arith.constant 0 : index
    %c192 = arith.constant 192 : index
    %459 = vector.load %arg17[%c0_203, %c192] : memref<2x256xf32, #tpu.memory_space<vmem>>, vector<1x32xf32>
    tpu.vector_store %arg17[%c0_203, %c192], %458 {strides = array<i32>} : memref<2x256xf32, #tpu.memory_space<vmem>>, vector<1x32xf32>,
    %460 = vector.extract_strided_slice %445 {offsets = [7, 0], sizes = [1, 32], strides = [1, 1]} : vector<16x32xf32> to vector<1x32xf32>
    %c0_204 = arith.constant 0 : index
    %c224 = arith.constant 224 : index
    %461 = vector.load %arg17[%c0_204, %c224] : memref<2x256xf32, #tpu.memory_space<vmem>>, vector<1x32xf32>
    tpu.vector_store %arg17[%c0_204, %c224], %460 {strides = array<i32>} : memref<2x256xf32, #tpu.memory_space<vmem>>, vector<1x32xf32>,
    %462 = vector.extract_strided_slice %445 {offsets = [8, 0], sizes = [1, 32], strides = [1, 1]} : vector<16x32xf32> to vector<1x32xf32>
    %c1_205 = arith.constant 1 : index
    %c0_206 = arith.constant 0 : index
    %463 = vector.load %arg17[%c1_205, %c0_206] : memref<2x256xf32, #tpu.memory_space<vmem>>, vector<1x32xf32>
    tpu.vector_store %arg17[%c1_205, %c0_206], %462 {strides = array<i32>} : memref<2x256xf32, #tpu.memory_space<vmem>>, vector<1x32xf32>,
    %464 = vector.extract_strided_slice %445 {offsets = [9, 0], sizes = [1, 32], strides = [1, 1]} : vector<16x32xf32> to vector<1x32xf32>
    %c1_207 = arith.constant 1 : index
    %c32_208 = arith.constant 32 : index
    %465 = vector.load %arg17[%c1_207, %c32_208] : memref<2x256xf32, #tpu.memory_space<vmem>>, vector<1x32xf32>
    tpu.vector_store %arg17[%c1_207, %c32_208], %464 {strides = array<i32>} : memref<2x256xf32, #tpu.memory_space<vmem>>, vector<1x32xf32>,
    %466 = vector.extract_strided_slice %445 {offsets = [10, 0], sizes = [1, 32], strides = [1, 1]} : vector<16x32xf32> to vector<1x32xf32>
    %c1_209 = arith.constant 1 : index
    %c64_210 = arith.constant 64 : index
    %467 = vector.load %arg17[%c1_209, %c64_210] : memref<2x256xf32, #tpu.memory_space<vmem>>, vector<1x32xf32>
    tpu.vector_store %arg17[%c1_209, %c64_210], %466 {strides = array<i32>} : memref<2x256xf32, #tpu.memory_space<vmem>>, vector<1x32xf32>,
    %468 = vector.extract_strided_slice %445 {offsets = [11, 0], sizes = [1, 32], strides = [1, 1]} : vector<16x32xf32> to vector<1x32xf32>
    %c1_211 = arith.constant 1 : index
    %c96_212 = arith.constant 96 : index
    %469 = vector.load %arg17[%c1_211, %c96_212] : memref<2x256xf32, #tpu.memory_space<vmem>>, vector<1x32xf32>
    tpu.vector_store %arg17[%c1_211, %c96_212], %468 {strides = array<i32>} : memref<2x256xf32, #tpu.memory_space<vmem>>, vector<1x32xf32>,
    %470 = vector.extract_strided_slice %445 {offsets = [12, 0], sizes = [1, 32], strides = [1, 1]} : vector<16x32xf32> to vector<1x32xf32>
    %c1_213 = arith.constant 1 : index
    %c128_214 = arith.constant 128 : index
    %471 = vector.load %arg17[%c1_213, %c128_214] : memref<2x256xf32, #tpu.memory_space<vmem>>, vector<1x32xf32>
    tpu.vector_store %arg17[%c1_213, %c128_214], %470 {strides = array<i32>} : memref<2x256xf32, #tpu.memory_space<vmem>>, vector<1x32xf32>,
    %472 = vector.extract_strided_slice %445 {offsets = [13, 0], sizes = [1, 32], strides = [1, 1]} : vector<16x32xf32> to vector<1x32xf32>
    %c1_215 = arith.constant 1 : index
    %c160_216 = arith.constant 160 : index
    %473 = vector.load %arg17[%c1_215, %c160_216] : memref<2x256xf32, #tpu.memory_space<vmem>>, vector<1x32xf32>
    tpu.vector_store %arg17[%c1_215, %c160_216], %472 {strides = array<i32>} : memref<2x256xf32, #tpu.memory_space<vmem>>, vector<1x32xf32>,
    %474 = vector.extract_strided_slice %445 {offsets = [14, 0], sizes = [1, 32], strides = [1, 1]} : vector<16x32xf32> to vector<1x32xf32>
    %c1_217 = arith.constant 1 : index
    %c192_218 = arith.constant 192 : index
    %475 = vector.load %arg17[%c1_217, %c192_218] : memref<2x256xf32, #tpu.memory_space<vmem>>, vector<1x32xf32>
    tpu.vector_store %arg17[%c1_217, %c192_218], %474 {strides = array<i32>} : memref<2x256xf32, #tpu.memory_space<vmem>>, vector<1x32xf32>,
    %476 = vector.extract_strided_slice %445 {offsets = [15, 0], sizes = [1, 32], strides = [1, 1]} : vector<16x32xf32> to vector<1x32xf32>
    %c1_219 = arith.constant 1 : index
    %c224_220 = arith.constant 224 : index
    %477 = vector.load %arg17[%c1_219, %c224_220] : memref<2x256xf32, #tpu.memory_space<vmem>>, vector<1x32xf32>
    tpu.vector_store %arg17[%c1_219, %c224_220], %476 {strides = array<i32>} : memref<2x256xf32, #tpu.memory_space<vmem>>, vector<1x32xf32>,
    %c0_221 = arith.constant 0 : index
    %c0_222 = arith.constant 0 : index
    %478 = vector.load %arg17[%c0_221, %c0_222] : memref<2x256xf32, #tpu.memory_space<vmem>>, vector<2x256xf32>
    %479 = arith.truncf %478 : vector<2x256xf32> to vector<2x256xbf16>
    %c0_223 = arith.constant 0 : index
    %c0_224 = arith.constant 0 : index
    %480 = vector.load %arg12[%c0_223, %c0_224] : memref<256x32xbf16, #tpu.memory_space<vmem>>, vector<256x32xbf16>
    %cst_225 = arith.constant dense<0.000000e+00> : vector<2x32xf32>
    %481 = tpu.matmul %479, %480, %cst_225 {dimension_numbers = #tpu.dot_dimension_numbers<[1], [0], [0], [1], [0, 0, 1, 1], [], []>} : vector<2x256xbf16>, vector<256x32xbf16>, vector<2x32xf32> -> vector<2x32xf32>
    %c0_226 = arith.constant 0 : index
    %c0_227 = arith.constant 0 : index
    %482 = vector.load %arg13[%c0_226, %c0_227] : memref<1x32xf32, #tpu.memory_space<vmem>>, vector<1x32xf32>
    %483 = vector.broadcast %482 : vector<1x32xf32> to vector<2x32xf32>
    %484 = arith.addf %481, %483 : vector<2x32xf32>
    %485 = arith.truncf %484 : vector<2x32xf32> to vector<2x32xbf16>
    %c0_228 = arith.constant 0 : index
    %c0_229 = arith.constant 0 : index
    %486 = vector.load %arg14[%c0_228, %c0_229] : memref<32x128xbf16, #tpu.memory_space<vmem>>, vector<32x128xbf16>
    %cst_230 = arith.constant dense<0.000000e+00> : vector<2x128xf32>
    %487 = tpu.matmul %485, %486, %cst_230 {dimension_numbers = #tpu.dot_dimension_numbers<[1], [0], [0], [1], [0, 0, 1, 1], [], []>} : vector<2x32xbf16>, vector<32x128xbf16>, vector<2x128xf32> -> vector<2x128xf32>
    %c0_231 = arith.constant 0 : index
    %c0_232 = arith.constant 0 : index
    %488 = vector.load %arg15[%c0_231, %c0_232] : memref<1x128xf32, #tpu.memory_space<vmem>>, vector<1x128xf32>
    %489 = vector.broadcast %488 : vector<1x128xf32> to vector<2x128xf32>
    %490 = arith.addf %487, %489 : vector<2x128xf32>
    %c0_233 = arith.constant 0 : index
    %c0_234 = arith.constant 0 : index
    %491 = vector.load %arg16[%c0_233, %c0_234] : memref<2x128xf32, #tpu.memory_space<vmem>>, vector<2x128xf32>
    tpu.vector_store %arg16[%c0_233, %c0_234], %490 {strides = array<i32>} : memref<2x128xf32, #tpu.memory_space<vmem>>, vector<2x128xf32>,
    return
  }
}

</mosaic_0001>

<bundles_post_ra>
// kernel: target_net_forward.1
= control target key start
LH: loop header
LB: loop body
LE: loop exit
PB: predicated region body
PF: predicated region fallthrough
CT: control target
= control target key end

     0   :  { %s3323_s0 = inlined_call_operand.vmem [shape: f32[16,32], index: 0, kind: input, shape index: {}]   ;;  %s3324_s1 = inlined_call_operand.vmem [shape: f32[16,16], index: 1, kind: input, shape index: {}]   ;;  %s3325_s2 = inlined_call_operand.vmem [shape: f32[2,32], index: 2, kind: input, shape index: {}]   ;;  %s3326_s3 = inlined_call_operand.vmem [shape: bf16[2,4,32,8], index: 3, kind: input, shape index: {}]   ;;  %s3327_s4 = inlined_call_operand.vmem [shape: f32[2,4,1,8], index: 4, kind: input, shape index: {}]   ;;  %s3328_s5 = inlined_call_operand.vmem [shape: bf16[2,64,32], index: 5, kind: input, shape index: {}]   ;;  %s3329_s6 = inlined_call_operand.vmem [shape: f32[2,64,1], index: 6, kind: input, shape index: {}]   ;;  %s3330_s7 = inlined_call_operand.vmem [shape: bf16[2,32,32], index: 7, kind: input, shape index: {}]   ;;  %s3331_s8 = inlined_call_operand.vmem [shape: bf16[2,32,64], index: 8, kind: input, shape index: {}]   ;;  %s3332_s9 = inlined_call_operand.vmem [shape: f32[2,1,64], index: 9, kind: input, shape index: {}]   ;;  %s3333_s10 = inlined_call_operand.vmem [shape: bf16[2,64,32], index: 10, kind: input, shape index: {}]   ;;  %s3334_s11 = inlined_call_operand.vmem [shape: f32[2,6,32], index: 11, kind: input, shape index: {}]   ;;  %s3335_s12 = inlined_call_operand.vmem [shape: bf16[256,32], index: 12, kind: input, shape index: {}]   ;;  %s3336_s13 = inlined_call_operand.vmem [shape: f32[1,32], index: 13, kind: input, shape index: {}]   ;;  %s3337_s14 = inlined_call_operand.vmem [shape: bf16[32,128], index: 14, kind: input, shape index: {}]   ;;  %s3338_s15 = inlined_call_operand.vmem [shape: f32[1,128], index: 15, kind: input, shape index: {}]   ;;  %s3339_s16 = inlined_call_operand.hbm [shape: f32[2,128], index: 16, kind: output, shape index: {}]  }
   0x1   :  { %3341 = sst [smem:[#allocation6_spill]] %s3323_s0 }
   0x2   :  { %s3342_s23 = sld [smem:[#allocation6_spill]]  ;;  %vm59_vm0 = vcmask 261120  }
   0x8   :  { %v55_v0 = vld [vmem:[%s3342_s23] sm:$0xff]  ;;  %v56_v2 = vld [vmem:[%s3342_s23 + $0x8] sm:$0xff] }
   0x9   :  { %v60_v1 = vsel %vm59_vm0, %v55_v0, 0.0 }
   0xa   :  { %61 = vadd.xlane.f32.xlu0 %v60_v1 }
   0xb   :  { %21 = vsyncpa [#allocation4], 0  ;;  %v63_v3 = vsel %vm59_vm0, %v56_v2, 0.0  ;;  %v2670_v4 = vmov 32.0   ;;  %v2476_v21 = vld [vmem:[%s3326_s3 + $0x8] sm:$0xff]  ;;  %v2475_v24 = vld [vmem:[%s3326_s3] sm:$0xff] }
   0xc   :  { %2548 = vrcp.f32 %v2670_v4  ;;  %278 = vmatpush.bf16.msra.mxu1 %v2476_v21  ;;  %v128_v32 = vld [vmem:[%s3329_s6] sm:$0xff]  ;;  %v2671_v34 = vmov 0   ;;  %v129_v40 = vld [vmem:[%s3329_s6 + $0x8] sm:$0xff]  ;;  %vm291_vm8 = vcmask 1043456   ;;  %v2478_v1 = vld [vmem:[%s3326_s3 + $0x18] sm:$0xff]  ;;  %vm287_vm9 = vcmask 64512  }
   0xd   :  { %2531 = vset.pattern.permute.xlu2 %v2671_v34  ;;  %2532 = vset.pattern.permute.xlu1 %v2671_v34  ;;  %v2534_v44 = vld [vmem:[%s3325_s2] ss:$0 sm:$0xff]  ;;  %v2535_v48 = vld [vmem:[%s3325_s2 + $0x1] ss:$0 sm:$0xff]  ;;  %vm309_vm10 = vcmask 130048   ;;  %s2674_s26 = smov 96  }
   0xe   :  { %138 = vperm.xlu2 %2531, %v128_v32   ;;  %2533 = vset.pattern.permute.xlu0 %v2671_v34  ;;  %v2471_v56 = vld [vmem:[%s3328_s5] sm:$0xff]  ;;  %s2124_s22 = sshll.u32 %s3339_s16, 4  ;;  %s2125_s22 = int_to_ptr.hbm [resolvable:$true] %s2124_s22 }
   0xf   :  { %v2536_v61 = vld [vmem:[%s3327_s4] ss:$0 sm:$0xff]  ;;  %v2537_v21 = vld [vmem:[%s3327_s4 + $0x1] ss:$0 sm:$0xff] }
  0x10   :  { %279 = vmatpush.bf16.msra.mxu1 %v2475_v24 }
  0x12   :  { %64 = vadd.xlane.f32.xlu0 %v63_v3  ;;  %v2549_v5 = vpop.eup %2548 }
  0x13   :  { %v67_v6 = vmul.f32 32.0, %v2549_v5  ;;  %vm71_vm1 = vweird.f32 %v2549_v5 }
  0x15   :  { %v68_v7 = vsub.f32 1.0, %v67_v6 }
  0x16   :  { %143 = vperm.xlu2 %2531, %v129_v40  }
  0x17   :  { %v69_v8 = vmul.f32 %v2549_v5, %v68_v7 }
  0x19   :  { %v70_v9 = vadd.f32 %v2549_v5, %v69_v8 }
  0x1b   :  { %v2769_v10 = vsel %vm71_vm1, %v2549_v5, %v70_v9  ;;  %v2477_v5 = vld [vmem:[%s3326_s3 + $0x10] sm:$0xff] }
  0x68   :  { %v139_v58 = vpop.permute.xlu2 %138 }
  0x70   :  { %v144_v6 = vpop.permute.xlu2 %143 }
  0x7d   :  { %v62_v11 = vpop.xlane.xlu0 %61 }
  0x7e   :  { %v73_v12 = vmul.f32 %v2769_v10, %v62_v11 }
  0x80   :  { %v75_v13 = vsub.f32 %v55_v0, %v73_v12  ;;  %v2828_v12 = vld [vmem:[%s3324_s1] sm:$0xff] }
  0x82   :  { %v77_v14 = vmul.f32 %v75_v13, %v75_v13 }
  0x84   :  { %v79_v15 = vsel %vm59_vm0, %v77_v14, 0.0 }
  0x85   :  { %80 = vadd.xlane.f32.xlu1 %v79_v15  ;;  %v65_v16 = vpop.xlane.xlu0 %64 }
  0x86   :  { %v74_v17 = vmul.f32 %v2769_v10, %v65_v16  ;;  %v2835_v16 = vld [vmem:[%s3324_s1 + $0x8] sm:$0xff] }
  0x88   :  { %v76_v18 = vsub.f32 %v56_v2, %v74_v17 }
  0x8a   :  { %v78_v19 = vmul.f32 %v76_v18, %v76_v18 }
  0x8c   :  { %v82_v20 = vsel %vm59_vm0, %v78_v19, 0.0 }
  0x8d   :  { %83 = vadd.xlane.f32.xlu1 %v82_v20 }
  0xf8   :  { %v81_v22 = vpop.xlane.xlu1 %80 }
  0xf9   :  { %v85_v23 = vmul.f32 %v81_v22, %v2769_v10 }
  0xfb   :  { %v87_v25 = vadd.f32 1e-12, %v85_v23 }
  0xfd   :  { %2550 = vrsqrt.f32 %v87_v25  ;;  %vm95_vm3 = vweird.f32 %v87_v25 }
 0x100   :  { %v84_v26 = vpop.xlane.xlu1 %83 }
 0x101   :  { %v86_v27 = vmul.f32 %v84_v26, %v2769_v10  ;;  %v2472_v26 = vld [vmem:[%s3328_s5 + $0x8] sm:$0xff] }
 0x103   :  { %v2551_v28 = vpop.eup %2550  ;;  %v88_v29 = vadd.f32 1e-12, %v86_v27  ;;  %v2473_v27 = vld [vmem:[%s3328_s5 + $0x10] sm:$0xff] }
 0x104   :  { %v90_v30 = vmul.f32 %v2551_v28, %v87_v25  ;;  %vm96_vm2 = vweird.f32 %v2551_v28 }
 0x105   :  { %2552 = vrsqrt.f32 %v88_v29  ;;  %vm97_vm4 = vmor %vm95_vm3, %vm96_vm2  ;;  %vm105_vm6 = vweird.f32 %v88_v29  ;;  %vm887_vm2 = vcmask 523264  }
 0x106   :  { %v91_v31 = vmul.f32 %v2551_v28, %v90_v30 }
 0x108   :  { %v92_v33 = vmul.f32 0.5, %v91_v31 }
 0x10a   :  { %v93_v35 = vsub.f32 1.5, %v92_v33 }
 0x10b   :  { %v2553_v36 = vpop.eup %2552 }
 0x10c   :  { %v94_v37 = vmul.f32 %v2551_v28, %v93_v35  ;;  %v100_v38 = vmul.f32 %v2553_v36, %v88_v29  ;;  %vm106_vm5 = vweird.f32 %v2553_v36 }
 0x10d   :  { %vm107_vm7 = vmor %vm105_vm6, %vm106_vm5 }
 0x10e   :  { %v101_v39 = vmul.f32 %v2553_v36, %v100_v38  ;;  %v98_v41 = vsel %vm97_vm4, %v2551_v28, %v94_v37  ;;  %v132_v28 = vld [vmem:[%s3329_s6 + $0x20] sm:$0xff] }
 0x10f   :  { %v109_v45 = vmul.f32 %v98_v41, %v75_v13 }
 0x110   :  { %v102_v42 = vmul.f32 0.5, %v101_v39 }
 0x111   :  { %v112_v49 = vmul.f32 %v2534_v44, %v109_v45  ;;  %v133_v45 = vld [vmem:[%s3329_s6 + $0x28] sm:$0xff] }
 0x112   :  { %v103_v43 = vsub.f32 1.5, %v102_v42 }
 0x113   :  { %v2795_v52 = vadd.f32 %v2535_v48, %v112_v49 }
 0x114   :  { %v104_v46 = vmul.f32 %v2553_v36, %v103_v43 }
 0x116   :  { %v108_v47 = vsel %vm107_vm7, %v2553_v36, %v104_v46 }
 0x117   :  { %v110_v50 = vmul.f32 %v108_v47, %v76_v18 }
 0x119   :  { %v113_v51 = vmul.f32 %v2534_v44, %v110_v50 }
 0x11b   :  { %v2797_v53 = vadd.f32 %v2535_v48, %v113_v51  ;;  %v2474_v51 = vld [vmem:[%s3328_s5 + $0x18] sm:$0xff] }
 0x11d   :  { %v2801_v54 = vpack.c.bf16 %v2797_v53, %v2795_v52 }
 0x11f   :  { %2161 = vmatmul.msk.bf16.vlgmr.msra.gmra.mxu1 %vm59_vm0, %v2801_v54  ;;  %v209_v55 = vsel %vm59_vm0, %v2801_v54, 0 }
 0x120   :  { %218 = vmatpush.bf16.xpose.msra.mxu0 %v209_v55 }
 0x127   :  { %2149 = vmatmul.msk.bf16.vlgmr.msra.gmra.mxu0 %vm59_vm0, %v2471_v56 }
 0x137   :  { %2150 = vmatmul.msk.bf16.gmra.mxu0 %vm59_vm0, %v2472_v26 }
 0x147   :  { %2151 = vmatmul.msk.bf16.gmra.mxu0 %vm59_vm0, %v2473_v27 }
 0x157   :  { %2152 = vmatmul.msk.bf16.gmra.mxu0 %vm59_vm0, %v2474_v51 }
 0x19c   :  { %v281_v57 = vpop.f32.mrf.mxu1 }
 0x19d   :  { %v282_v2 = vadd.f32 %v2536_v61, %v281_v57 }
 0x1a4   :  { %v220_v59 = vpop.f32.mrf.mxu0  ;;  %v283_v60 = vpop.f32.mrf.mxu1 }
 0x1a5   :  { %v221_v62 = vadd.f32 %v220_v59, %v139_v58  ;;  %v284_v0 = vadd.f32 %v2536_v61, %v283_v60 }
 0x1a7   :  { %v240_v63 = vpack.c.bf16 %v221_v62, %v221_v62  ;;  %v286_v4 = vpack.c.bf16 %v284_v0, %v282_v2 }
 0x1a9   :  { %v293_v3 = vsel %vm291_vm8, %v240_v63, 0 }
 0x1aa   :  { %302 = vmatpush.bf16.msra.mxu2 %v293_v3 }
 0x1ac   :  { %v222_v7 = vpop.f32.mrf.mxu0 }
 0x1ad   :  { %v223_v8 = vadd.f32 %v222_v7, %v144_v6  ;;  %2162 = vmatmul.msk.bf16.vlgmr.msra.gmra.mxu2 %vm287_vm9, %v286_v4 }
 0x1ae   :  { %382 = vmatpush.bf16.msrb.mxu2 %v2478_v1 }
 0x1af   :  { %v241_v9 = vpack.c.bf16 %v223_v8, %v223_v8 }
 0x1b1   :  { %v395_v11 = vsel %vm291_vm8, %v241_v9, 0 }
 0x1b2   :  { %383 = vmatpush.bf16.msrb.mxu2 %v2477_v5  ;;  %404 = vmatpush.bf16.msrb.mxu1 %v395_v11  ;;  %v134_v11 = vld [vmem:[%s3329_s6 + $0x30] sm:$0xff] }
 0x1b4   :  { %v2863_v46 = vpop.f32.mrf.mxu0 }
 0x1bc   :  { %v2865_v47 = vpop.f32.mrf.mxu0 }
 0x1bd   :  { %2177 = vmatmul.msk.bf16.vlgmr.msrb.gmra.mxu2 %vm59_vm0, %v2801_v54 }
 0x1c4   :  { %v230_v49 = vpop.f32.mrf.mxu0 }
 0x230   :  { %v304_v13 = vpop.f32.mrf.mxu2 }
 0x231   :  { %v305_v14 = vadd.f32 %v304_v13, %v2828_v12  ;;  %v130_v13 = vld [vmem:[%s3329_s6 + $0x10] sm:$0xff] }
 0x233   :  { %v310_v15 = vsel %vm309_vm10, %v305_v14, -inf }
 0x234   :  { %311 = vmax.xlane.f32.xlu0 %v310_v15 }
 0x238   :  { %v306_v17 = vpop.f32.mrf.mxu2 }
 0x239   :  { %v307_v18 = vadd.f32 %v306_v17, %v2835_v16 }
 0x23b   :  { %v313_v19 = vsel %vm309_vm10, %v307_v18, -inf }
 0x23c   :  { %314 = vmax.xlane.f32.xlu1 %v313_v19 }
 0x240   :  { %v385_v20 = vpop.f32.mrf.mxu2 }
 0x241   :  { %v386_v23 = vadd.f32 %v2537_v21, %v385_v20  ;;  %v249_v20 = vld [vmem:[%s3330_s7 + $0x4] sm:$0xf] }
 0x248   :  { %v387_v22 = vpop.f32.mrf.mxu2 }
 0x249   :  { %v388_v24 = vadd.f32 %v2537_v21, %v387_v22  ;;  %v459_v21 = vsel %vm291_vm8, %v249_v20, 0  ;;  %v248_v22 = vld [vmem:[%s3330_s7] sm:$0xf] }
 0x24a   :  { %468 = vmatpush.bf16.msra.mxu2 %v459_v21 }
 0x24b   :  { %v390_v25 = vpack.c.bf16 %v388_v24, %v386_v23  ;;  %v2480_v23 = vld [vmem:[%s3326_s3 + $0x28] sm:$0xff]  ;;  %v479_v24 = vsel %vm291_vm8, %v248_v22, 0 }
 0x24c   :  { %488 = vmatpush.bf16.msra.mxu1 %v479_v24 }
 0x24d   :  { %2178 = vmatmul.msk.bf16.vlgmr.msrb.gmra.mxu1 %vm287_vm9, %v390_v25  ;;  %v2479_v25 = vld [vmem:[%s3326_s3 + $0x20] sm:$0xff] }
 0x255   :  { %158 = vperm.xlu1 %2532, %v132_v28  }
 0x2a7   :  { %v312_v29 = vpop.xlane.xlu0 %311 }
 0x2a8   :  { %v316_v32 = vsub.f32 %v305_v14, %v312_v29  ;;  %v232_v14 = vpop.f32.mrf.mxu0 }
 0x2aa   :  { %v318_v34 = vmul.f32 1.442695, %v316_v32 }
 0x2ac   :  { %2554 = vpow2.f32 %v318_v34 }
 0x2af   :  { %v315_v35 = vpop.xlane.xlu1 %314 }
 0x2b0   :  { %v317_v38 = vsub.f32 %v307_v18, %v315_v35 }
 0x2b2   :  { %v320_v40 = vmul.f32 1.442695, %v317_v38  ;;  %v2555_v41 = vpop.eup %2554 }
 0x2b3   :  { %v322_v42 = vsel %vm309_vm10, %v2555_v41, 0.0 }
 0x2b4   :  { %2556 = vpow2.f32 %v320_v40 }
 0x2ba   :  { %v2557_v43 = vpop.eup %2556 }
 0x2bb   :  { %v325_v44 = vsel %vm309_vm10, %v2557_v43, 0.0 }
 0x2c7   :  { %v159_v48 = vpop.permute.xlu1 %158 }
 0x2c8   :  { %v231_v50 = vadd.f32 %v230_v49, %v159_v48  ;;  %v2482_v48 = vld [vmem:[%s3326_s3 + $0x38] sm:$0xff] }
 0x2ca   :  { %v406_v30 = vpop.f32.mrf.mxu1  ;;  %v244_v55 = vpack.c.bf16 %v231_v50, %v231_v50  ;;  %v2481_v50 = vld [vmem:[%s3326_s3 + $0x30] sm:$0xff] }
 0x2cb   :  { %v407_v31 = vadd.f32 %v406_v30, %v2828_v12 }
 0x2cc   :  { %v337_v56 = vsel %vm309_vm10, %v244_v55, 0  ;;  %v2538_v55 = vld [vmem:[%s3327_s4 + $0x2] ss:$0 sm:$0xff] }
 0x2cd   :  { %v411_v33 = vsel %vm309_vm10, %v407_v31, -inf  ;;  %346 = vmatpush.bf16.xpose.msra.mxu3 %v337_v56 }
 0x2ce   :  { %412 = vmax.xlane.f32.xlu2 %v411_v33 }
 0x2d2   :  { %v408_v36 = vpop.f32.mrf.mxu1 }
 0x2d3   :  { %v409_v37 = vadd.f32 %v408_v36, %v2835_v16 }
 0x2d5   :  { %v414_v39 = vsel %vm309_vm10, %v409_v37, -inf }
 0x2d6   :  { %415 = vmax.xlane.f32.xlu0 %v414_v39 }
 0x2de   :  { %323 = vadd.xlane.f32.xlu0 %v322_v42 }
 0x2e6   :  { %326 = vadd.xlane.f32.xlu0 %v325_v44 }
 0x2fa   :  { %163 = vperm.xlu0 %2533, %v133_v45  }
 0x341   :  { %v413_v57 = vpop.xlane.xlu2 %412 }
 0x342   :  { %v417_v58 = vsub.f32 %v407_v31, %v413_v57 }
 0x344   :  { %v419_v59 = vmul.f32 1.442695, %v417_v58 }
 0x346   :  { %2558 = vpow2.f32 %v419_v59 }
 0x349   :  { %v416_v60 = vpop.xlane.xlu0 %415 }
 0x34a   :  { %v418_v61 = vsub.f32 %v409_v37, %v416_v60  ;;  %v235_v37 = vpop.f32.mrf.mxu0 }
 0x34c   :  { %v2559_v62 = vpop.eup %2558  ;;  %v421_v63 = vmul.f32 1.442695, %v418_v61 }
 0x34d   :  { %v423_v0 = vsel %vm309_vm10, %v2559_v62, 0.0 }
 0x34e   :  { %2560 = vpow2.f32 %v421_v63  ;;  %424 = vadd.xlane.f32.xlu1 %v423_v0 }
 0x351   :  { %v324_v1 = vpop.xlane.xlu0 %323 }
 0x352   :  { %2562 = vrcp.f32 %v324_v1 }
 0x354   :  { %v2561_v2 = vpop.eup %2560 }
 0x355   :  { %v426_v3 = vsel %vm309_vm10, %v2561_v2, 0.0 }
 0x356   :  { %427 = vadd.xlane.f32.xlu2 %v426_v3 }
 0x358   :  { %v2563_v5 = vpop.eup %2562 }
 0x359   :  { %v327_v4 = vpop.xlane.xlu0 %326  ;;  %v330_v7 = vmul.f32 %v2563_v5, %v2555_v41 }
 0x35a   :  { %2564 = vrcp.f32 %v327_v4  ;;  %v131_v4 = vld [vmem:[%s3329_s6 + $0x18] sm:$0xff] }
 0x360   :  { %v2565_v6 = vpop.eup %2564 }
 0x361   :  { %v331_v8 = vmul.f32 %v2565_v6, %v2557_v43 }
 0x363   :  { %v332_v9 = vpack.c.bf16 %v331_v8, %v330_v7 }
 0x365   :  { %2163 = vmatmul.msk.bf16.vlgmr.msra.gmra.mxu3 %vm309_vm10, %v332_v9 }
 0x367   :  { %168 = vperm.xlu1 %2532, %v134_v11  }
 0x36c   :  { %v164_v15 = vpop.permute.xlu0 %163 }
 0x36d   :  { %v233_v17 = vadd.f32 %v232_v14, %v164_v15 }
 0x36e   :  { %148 = vperm.xlu2 %2531, %v130_v13  }
 0x36f   :  { %v245_v18 = vpack.c.bf16 %v233_v17, %v233_v17 }
 0x371   :  { %v438_v19 = vsel %vm309_vm10, %v245_v18, 0 }
 0x372   :  { %447 = vmatpush.bf16.xpose.msrb.mxu3 %v438_v19 }
 0x37a   :  { %523 = vmatpush.bf16.msra.mxu3 %v2480_v23 }
 0x37e   :  { %524 = vmatpush.bf16.msra.mxu3 %v2479_v25 }
 0x3c1   :  { %v425_v26 = vpop.xlane.xlu1 %424 }
 0x3c2   :  { %2566 = vrcp.f32 %v425_v26 }
 0x3c8   :  { %v2567_v28 = vpop.eup %2566 }
 0x3c9   :  { %v428_v27 = vpop.xlane.xlu2 %427  ;;  %v431_v30 = vmul.f32 %v2567_v28, %v2559_v62 }
 0x3ca   :  { %2568 = vrcp.f32 %v428_v27 }
 0x3d0   :  { %v2569_v29 = vpop.eup %2568 }
 0x3d1   :  { %v432_v31 = vmul.f32 %v2569_v29, %v2561_v2  ;;  %v149_v32 = vpop.permute.xlu2 %148 }
 0x3d2   :  { %v226_v33 = vadd.f32 %v2863_v46, %v149_v32 }
 0x3d3   :  { %v433_v34 = vpack.c.bf16 %v432_v31, %v431_v30 }
 0x3d4   :  { %v242_v35 = vpack.c.bf16 %v226_v33, %v226_v33 }
 0x3d5   :  { %2179 = vmatmul.msk.bf16.vlgmr.msrb.gmra.mxu3 %vm309_vm10, %v433_v34 }
 0x3d6   :  { %v536_v36 = vsel %vm291_vm8, %v242_v35, 0 }
 0x3d7   :  { %545 = vmatpush.bf16.msrb.mxu2 %v536_v36  ;;  %v2539_v36 = vld [vmem:[%s3327_s4 + $0x3] ss:$0 sm:$0xff] }
 0x3d9   :  { %v169_v38 = vpop.permute.xlu1 %168 }
 0x3da   :  { %v236_v39 = vadd.f32 %v235_v37, %v169_v38 }
 0x3dc   :  { %v246_v40 = vpack.c.bf16 %v236_v39, %v236_v39 }
 0x3de   :  { %v579_v41 = vsel %vm309_vm10, %v246_v40, 0 }
 0x3df   :  { %588 = vmatpush.bf16.xpose.msrb.mxu1 %v579_v41 }
 0x3e5   :  { %2195 = vmatmul.msk.bf16.vlgmr.msra.gmra.mxu3 %vm59_vm0, %v2801_v54 }
 0x3e8   :  { %v348_v42 = vpop.f32.mrf.mxu3 }
 0x3f0   :  { %v350_v43 = vpop.f32.mrf.mxu3 }
 0x3f1   :  { %v353_v44 = vpack.c.bf16 %v350_v43, %v348_v42 }
 0x3f3   :  { %2181 = vmatmul.msk.bf16.vlgmr.msra.gmra.mxu1 %vm287_vm9, %v353_v44 }
 0x458   :  { %v449_v45 = vpop.f32.mrf.mxu3 }
 0x460   :  { %v451_v46 = vpop.f32.mrf.mxu3 }
 0x461   :  { %v454_v49 = vpack.c.bf16 %v451_v46, %v449_v45 }
 0x463   :  { %2180 = vmatmul.msk.bf16.vlgmr.msra.gmra.mxu2 %vm287_vm9, %v454_v49 }
 0x464   :  { %646 = vmatpush.bf16.msra.mxu2 %v2482_v48 }
 0x468   :  { %v526_v51 = vpop.f32.mrf.mxu3  ;;  %647 = vmatpush.bf16.msra.mxu2 %v2481_v50 }
 0x469   :  { %v527_v57 = vadd.f32 %v2538_v55, %v526_v51 }
 0x470   :  { %v528_v56 = vpop.f32.mrf.mxu3 }
 0x471   :  { %v529_v58 = vadd.f32 %v2538_v55, %v528_v56  ;;  %v135_v56 = vld [vmem:[%s3329_s6 + $0x38] sm:$0xff] }
 0x473   :  { %v531_v59 = vpack.c.bf16 %v529_v58, %v527_v57 }
 0x475   :  { %2196 = vmatmul.msk.bf16.vlgmr.msrb.gmra.mxu2 %vm287_vm9, %v531_v59 }
 0x485   :  { %2212 = vmatmul.msk.bf16.vlgmr.msra.gmra.mxu2 %vm59_vm0, %v2801_v54  ;;  %v250_v54 = vld [vmem:[%s3330_s7 + $0x8] sm:$0xf] }
 0x486   :  { %v600_v5 = vsel %vm291_vm8, %v250_v54, 0 }
 0x487   :  { %609 = vmatpush.bf16.msrb.mxu3 %v600_v5 }
 0x4e6   :  { %v470_v60 = vpop.f32.mrf.mxu2 }
 0x4ee   :  { %v472_v61 = vpop.f32.mrf.mxu2 }
 0x4f8   :  { %v547_v62 = vpop.f32.mrf.mxu2 }
 0x4f9   :  { %v548_v63 = vadd.f32 %v547_v62, %v2828_v12 }
 0x4fb   :  { %v552_v0 = vsel %vm309_vm10, %v548_v63, -inf }
 0x4fc   :  { %553 = vmax.xlane.f32.xlu0 %v552_v0 }
 0x500   :  { %v549_v1 = vpop.f32.mrf.mxu2 }
 0x501   :  { %v550_v2 = vadd.f32 %v549_v1, %v2835_v16 }
 0x503   :  { %v555_v3 = vsel %vm309_vm10, %v550_v2, -inf }
 0x504   :  { %556 = vmax.xlane.f32.xlu2 %v555_v3  ;;  %v237_v3 = vpop.f32.mrf.mxu0 }
 0x508   :  { %v649_v32 = vpop.f32.mrf.mxu2 }
 0x509   :  { %v650_v38 = vadd.f32 %v2539_v36, %v649_v32 }
 0x510   :  { %v651_v35 = vpop.f32.mrf.mxu2 }
 0x511   :  { %v652_v37 = vadd.f32 %v2539_v36, %v651_v35 }
 0x513   :  { %v654_v39 = vpack.c.bf16 %v652_v37, %v650_v38 }
 0x51c   :  { %153 = vperm.xlu2 %2531, %v131_v4  }
 0x56f   :  { %v554_v6 = vpop.xlane.xlu0 %553 }
 0x570   :  { %v558_v7 = vsub.f32 %v548_v63, %v554_v6 }
 0x572   :  { %v560_v8 = vmul.f32 1.442695, %v558_v7 }
 0x574   :  { %2570 = vpow2.f32 %v560_v8 }
 0x577   :  { %v557_v9 = vpop.xlane.xlu2 %556 }
 0x578   :  { %v559_v11 = vsub.f32 %v550_v2, %v557_v9 }
 0x57a   :  { %v2571_v13 = vpop.eup %2570  ;;  %v562_v14 = vmul.f32 1.442695, %v559_v11 }
 0x57b   :  { %v564_v15 = vsel %vm309_vm10, %v2571_v13, 0.0 }
 0x57c   :  { %2572 = vpow2.f32 %v562_v14  ;;  %565 = vadd.xlane.f32.xlu1 %v564_v15 }
 0x57f   :  { %v154_v17 = vpop.permute.xlu2 %153 }
 0x580   :  { %v228_v18 = vadd.f32 %v2865_v47, %v154_v17  ;;  %v490_v47 = vpop.f32.mrf.mxu1  ;;  %v251_v17 = vld [vmem:[%s3330_s7 + $0xc] sm:$0xf] }
 0x581   :  { %v491_v40 = vadd.f32 %v490_v47, %v470_v60 }
 0x582   :  { %v2573_v19 = vpop.eup %2572  ;;  %v243_v20 = vpack.c.bf16 %v228_v18, %v228_v18  ;;  %v723_v18 = vsel %vm291_vm8, %v251_v17, 0  ;;  %v2485_v17 = vld [vmem:[%s3333_s10] sm:$0xff] }
 0x583   :  { %v567_v21 = vsel %vm309_vm10, %v2573_v19, 0.0 }
 0x584   :  { %v659_v22 = vsel %vm291_vm8, %v243_v20, 0  ;;  %568 = vadd.xlane.f32.xlu0 %v567_v21 }
 0x585   :  { %668 = vmatpush.bf16.msra.mxu3 %v659_v22  ;;  %v2956_v22 = vld [vmem:[%s3334_s11] sm:$0x3f] }
 0x588   :  { %v492_v30 = vpop.f32.mrf.mxu1 }
 0x589   :  { %v493_v43 = vadd.f32 %v492_v30, %v472_v61 }
 0x5ef   :  { %v566_v23 = vpop.xlane.xlu1 %565 }
 0x5f0   :  { %2574 = vrcp.f32 %v566_v23 }
 0x5f6   :  { %v2575_v25 = vpop.eup %2574 }
 0x5f7   :  { %v569_v24 = vpop.xlane.xlu0 %568  ;;  %v572_v27 = vmul.f32 %v2575_v25, %v2571_v13  ;;  %v744_v25 = vperm.slane %v2956_v22, 0 }
 0x5f8   :  { %2576 = vrcp.f32 %v569_v24 }
 0x5fe   :  { %v2577_v26 = vpop.eup %2576 }
 0x5ff   :  { %v573_v28 = vmul.f32 %v2577_v26, %v2573_v19 }
 0x601   :  { %v574_v29 = vpack.c.bf16 %v573_v28, %v572_v27 }
 0x603   :  { %2197 = vmatmul.msk.bf16.vlgmr.msrb.gmra.mxu1 %vm309_vm10, %v574_v29 }
 0x680   :  { %v590_v31 = vpop.f32.mrf.mxu1 }
 0x688   :  { %v592_v33 = vpop.f32.mrf.mxu1 }
 0x689   :  { %v595_v34 = vpack.c.bf16 %v592_v33, %v590_v31 }
 0x68b   :  { %2198 = vmatmul.msk.bf16.vlgmr.msrb.gmra.mxu3 %vm287_vm9, %v595_v34 }
 0x68c   :  { %732 = vmatpush.bf16.msrb.mxu3 %v723_v18  ;;  %v2540_v18 = vld [vmem:[%s3332_s9] ss:$0 sm:$0xff] }
 0x69b   :  { %2213 = vmatmul.msk.bf16.vlgmr.msra.gmra.mxu3 %vm287_vm9, %v654_v39 }
 0x70e   :  { %v611_v41 = vpop.f32.mrf.mxu3 }
 0x70f   :  { %v616_v42 = vadd.f32 %v611_v41, %v491_v40 }
 0x716   :  { %v613_v44 = vpop.f32.mrf.mxu3 }
 0x717   :  { %v617_v45 = vadd.f32 %v613_v44, %v493_v43  ;;  %v2483_v44 = vld [vmem:[%s3331_s8] sm:$0xff] }
 0x71e   :  { %v670_v46 = vpop.f32.mrf.mxu3 }
 0x71f   :  { %v671_v48 = vadd.f32 %v670_v46, %v2828_v12  ;;  %v2488_v46 = vld [vmem:[%s3333_s10 + $0x18] sm:$0xff] }
 0x720   :  { %895 = vmatpush.bf16.msrb.mxu0 %v2488_v46 }
 0x721   :  { %v675_v49 = vsel %vm309_vm10, %v671_v48, -inf }
 0x722   :  { %676 = vmax.xlane.f32.xlu0 %v675_v49 }
 0x726   :  { %v672_v50 = vpop.f32.mrf.mxu3 }
 0x727   :  { %v673_v51 = vadd.f32 %v672_v50, %v2835_v16  ;;  %v2487_v50 = vld [vmem:[%s3333_s10 + $0x10] sm:$0xff] }
 0x728   :  { %896 = vmatpush.bf16.msrb.mxu0 %v2487_v50 }
 0x729   :  { %v678_v55 = vsel %vm309_vm10, %v673_v51, -inf }
 0x72a   :  { %679 = vmax.xlane.f32.xlu0 %v678_v55 }
 0x73e   :  { %173 = vperm.xlu0 %2533, %v135_v56  }
 0x795   :  { %v677_v57 = vpop.xlane.xlu0 %676 }
 0x796   :  { %v681_v58 = vsub.f32 %v671_v48, %v677_v57 }
 0x798   :  { %v683_v59 = vmul.f32 1.442695, %v681_v58 }
 0x79a   :  { %2578 = vpow2.f32 %v683_v59 }
 0x79d   :  { %v680_v60 = vpop.xlane.xlu0 %679 }
 0x79e   :  { %v682_v61 = vsub.f32 %v673_v51, %v680_v60 }
 0x7a0   :  { %v2579_v62 = vpop.eup %2578  ;;  %v685_v63 = vmul.f32 1.442695, %v682_v61 }
 0x7a1   :  { %v687_v0 = vsel %vm309_vm10, %v2579_v62, 0.0 }
 0x7a2   :  { %2580 = vpow2.f32 %v685_v63  ;;  %688 = vadd.xlane.f32.xlu2 %v687_v0 }
 0x7a8   :  { %v2581_v1 = vpop.eup %2580 }
 0x7a9   :  { %v690_v2 = vsel %vm309_vm10, %v2581_v1, 0.0 }
 0x7aa   :  { %691 = vadd.xlane.f32.xlu1 %v690_v2 }
 0x7b0   :  { %v174_v4 = vpop.permute.xlu0 %173 }
 0x7b1   :  { %v238_v54 = vadd.f32 %v237_v3, %v174_v4  ;;  %v791_v3 = vperm.slane %v2956_v22, 2 }
 0x7b3   :  { %v247_v5 = vpack.c.bf16 %v238_v54, %v238_v54 }
 0x7b5   :  { %v702_v6 = vsel %vm309_vm10, %v247_v5, 0 }
 0x7b6   :  { %711 = vmatpush.bf16.xpose.msra.mxu1 %v702_v6  ;;  %v794_v6 = vperm.slane %v2956_v22, 3 }
 0x815   :  { %v689_v7 = vpop.xlane.xlu2 %688 }
 0x816   :  { %2582 = vrcp.f32 %v689_v7 }
 0x81c   :  { %v2583_v9 = vpop.eup %2582 }
 0x81d   :  { %v692_v8 = vpop.xlane.xlu1 %691  ;;  %v695_v13 = vmul.f32 %v2583_v9, %v2579_v62 }
 0x81e   :  { %2584 = vrcp.f32 %v692_v8 }
 0x824   :  { %v2585_v11 = vpop.eup %2584 }
 0x825   :  { %v696_v14 = vmul.f32 %v2585_v11, %v2581_v1 }
 0x827   :  { %v697_v15 = vpack.c.bf16 %v696_v14, %v695_v13 }
 0x829   :  { %2214 = vmatmul.msk.bf16.vlgmr.msra.gmra.mxu1 %vm309_vm10, %v697_v15  ;;  %v2486_v15 = vld [vmem:[%s3333_s10 + $0x8] sm:$0xff] }
 0x82a   :  { %897 = vmatpush.bf16.msrb.mxu0 %v2486_v15 }
 0x82e   :  { %898 = vmatpush.bf16.msrb.mxu0 %v2485_v17  ;;  %v2495_v17 = vld [vmem:[%s3326_s3 + $0x50] sm:$0xff] }
 0x8a6   :  { %v713_v19 = vpop.f32.mrf.mxu1 }
 0x8ae   :  { %v715_v20 = vpop.f32.mrf.mxu1 }
 0x8af   :  { %v718_v21 = vpack.c.bf16 %v715_v20, %v713_v19 }
 0x8b1   :  { %2215 = vmatmul.msk.bf16.vlgmr.msrb.gmra.mxu3 %vm287_vm9, %v718_v21 }
 0x934   :  { %v734_v23 = vpop.f32.mrf.mxu3 }
 0x935   :  { %v739_v24 = vadd.f32 %v734_v23, %v616_v42 }
 0x937   :  { %v742_v26 = vadd.f32 %v739_v24, %v2795_v52 }
 0x939   :  { %v745_v27 = vadd.f32 %v744_v25, %v742_v26 }
 0x93b   :  { %v747_v28 = vsel %vm59_vm0, %v745_v27, 0.0 }
 0x93c   :  { %748 = vadd.xlane.f32.xlu1 %v747_v28  ;;  %v736_v29 = vpop.f32.mrf.mxu3 }
 0x93d   :  { %v740_v47 = vadd.f32 %v736_v29, %v617_v45 }
 0x93f   :  { %v743_v30 = vadd.f32 %v740_v47, %v2797_v53  ;;  %v2484_v53 = vld [vmem:[%s3331_s8 + $0x8] sm:$0xff] }
 0x940   :  { %827 = vmatpush.bf16.msrb.mxu2 %v2484_v53 }
 0x941   :  { %v746_v31 = vadd.f32 %v744_v25, %v743_v30 }
 0x943   :  { %v750_v32 = vsel %vm59_vm0, %v746_v31, 0.0 }
 0x944   :  { %751 = vadd.xlane.f32.xlu0 %v750_v32  ;;  %828 = vmatpush.bf16.msrb.mxu2 %v2483_v44 }
 0x9af   :  { %v749_v33 = vpop.xlane.xlu1 %748 }
 0x9b0   :  { %v753_v34 = vmul.f32 %v749_v33, %v2769_v10 }
 0x9b2   :  { %v755_v35 = vsub.f32 %v745_v27, %v753_v34 }
 0x9b4   :  { %v757_v36 = vmul.f32 %v755_v35, %v755_v35 }
 0x9b6   :  { %v759_v37 = vsel %vm59_vm0, %v757_v36, 0.0 }
 0x9b7   :  { %760 = vadd.xlane.f32.xlu1 %v759_v37  ;;  %v752_v52 = vpop.xlane.xlu0 %751 }
 0x9b8   :  { %v754_v38 = vmul.f32 %v752_v52, %v2769_v10 }
 0x9ba   :  { %v756_v39 = vsub.f32 %v746_v31, %v754_v38 }
 0x9bc   :  { %v758_v40 = vmul.f32 %v756_v39, %v756_v39 }
 0x9be   :  { %v762_v41 = vsel %vm59_vm0, %v758_v40, 0.0 }
 0x9bf   :  { %763 = vadd.xlane.f32.xlu1 %v762_v41  ;;  %v862_v41 = vperm.slane %v2956_v22, 1 }
 0xa2a   :  { %v761_v42 = vpop.xlane.xlu1 %760 }
 0xa2b   :  { %v765_v43 = vmul.f32 %v761_v42, %v2769_v10 }
 0xa2d   :  { %v767_v45 = vadd.f32 1e-12, %v765_v43 }
 0xa2f   :  { %2586 = vrsqrt.f32 %v767_v45  ;;  %vm775_vm12 = vweird.f32 %v767_v45 }
 0xa32   :  { %v764_v48 = vpop.xlane.xlu1 %763 }
 0xa33   :  { %v766_v49 = vmul.f32 %v764_v48, %v2769_v10 }
 0xa35   :  { %v2587_v51 = vpop.eup %2586  ;;  %v768_v55 = vadd.f32 1e-12, %v766_v49 }
 0xa36   :  { %v770_v56 = vmul.f32 %v2587_v51, %v767_v45  ;;  %vm776_vm11 = vweird.f32 %v2587_v51 }
 0xa37   :  { %2588 = vrsqrt.f32 %v768_v55  ;;  %vm777_vm13 = vmor %vm775_vm12, %vm776_vm11  ;;  %vm785_vm15 = vweird.f32 %v768_v55 }
 0xa38   :  { %v771_v57 = vmul.f32 %v2587_v51, %v770_v56 }
 0xa3a   :  { %v772_v58 = vmul.f32 0.5, %v771_v57 }
 0xa3c   :  { %v773_v59 = vsub.f32 1.5, %v772_v58 }
 0xa3d   :  { %v2589_v60 = vpop.eup %2588 }
 0xa3e   :  { %v774_v61 = vmul.f32 %v2587_v51, %v773_v59  ;;  %v780_v62 = vmul.f32 %v2589_v60, %v768_v55  ;;  %vm786_vm14 = vweird.f32 %v2589_v60 }
 0xa3f   :  { %vm787_vm1 = vmor %vm785_vm15, %vm786_vm14 }
 0xa40   :  { %v781_v63 = vmul.f32 %v2589_v60, %v780_v62  ;;  %v778_v0 = vsel %vm777_vm13, %v2587_v51, %v774_v61 }
 0xa41   :  { %v789_v4 = vmul.f32 %v778_v0, %v755_v35  ;;  %v2251_v0 = vld [vmem:[%s3329_s6 + $0x48] sm:$0xff] }
 0xa42   :  { %v782_v1 = vmul.f32 0.5, %v781_v63  ;;  %v2250_v63 = vld [vmem:[%s3329_s6 + $0x40] sm:$0xff] }
 0xa43   :  { %v792_v7 = vmul.f32 %v791_v3, %v789_v4 }
 0xa44   :  { %v783_v2 = vsub.f32 1.5, %v782_v1  ;;  %v2254_v1 = vld [vmem:[%s3329_s6 + $0x60] sm:$0xff] }
 0xa45   :  { %v795_v11 = vadd.f32 %v794_v6, %v792_v7 }
 0xa46   :  { %v784_v54 = vmul.f32 %v2589_v60, %v783_v2  ;;  %v2494_v2 = vld [vmem:[%s3326_s3 + $0x48] sm:$0xff] }
 0xa47   :  { %1121 = vmatpush.bf16.msra.mxu3 %v2494_v2 }
 0xa48   :  { %v788_v5 = vsel %vm787_vm1, %v2589_v60, %v784_v54  ;;  %v2493_v54 = vld [vmem:[%s3326_s3 + $0x40] sm:$0xff] }
 0xa49   :  { %v790_v8 = vmul.f32 %v788_v5, %v756_v39 }
 0xa4b   :  { %v793_v9 = vmul.f32 %v791_v3, %v790_v8  ;;  %1122 = vmatpush.bf16.msra.mxu3 %v2493_v54 }
 0xa4d   :  { %v796_v13 = vadd.f32 %v794_v6, %v793_v9 }
 0xa4f   :  { %v797_v14 = vpack.c.bf16 %v796_v13, %v795_v11 }
 0xa51   :  { %2224 = vmatmul.msk.bf16.vlgmr.msrb.gmra.mxu2 %vm59_vm0, %v797_v14  ;;  %v2496_v14 = vld [vmem:[%s3326_s3 + $0x58] sm:$0xff] }
 0xa52   :  { %1222 = vmatpush.bf16.msrb.mxu3 %v2496_v14 }
 0xa56   :  { %1223 = vmatpush.bf16.msrb.mxu3 %v2495_v17 }
 0xad4   :  { %v830_v19 = vpop.f32.mrf.mxu2 }
 0xad5   :  { %v831_v20 = vadd.f32 %v2540_v18, %v830_v19 }
 0xad7   :  { %v837_v21 = vmul.f32 0.044715, %v831_v20  ;;  %v835_v36 = vmul.f32 0.5, %v831_v20 }
 0xad9   :  { %v839_v23 = vmul.f32 %v837_v21, %v831_v20 }
 0xadb   :  { %v841_v24 = vmul.f32 %v839_v23, %v831_v20 }
 0xadc   :  { %v832_v25 = vpop.f32.mrf.mxu2 }
 0xadd   :  { %v843_v26 = vadd.f32 %v841_v24, %v831_v20  ;;  %v833_v27 = vadd.f32 %v2540_v18, %v832_v25 }
 0xadf   :  { %v838_v28 = vmul.f32 0.044715, %v833_v27  ;;  %v845_v29 = vmul.f32 0.7978846, %v843_v26  ;;  %v836_v37 = vmul.f32 0.5, %v833_v27 }
 0xae1   :  { %v840_v47 = vmul.f32 %v838_v28, %v833_v27  ;;  %2590 = vtanh.f32 %v845_v29 }
 0xae3   :  { %v842_v30 = vmul.f32 %v840_v47, %v833_v27 }
 0xae5   :  { %v844_v31 = vadd.f32 %v842_v30, %v833_v27  ;;  %v951_v27 = vperm.slane %v2956_v22, 4  ;;  %v954_v30 = vperm.slane %v2956_v22, 5  ;;  %v2489_v22 = vld [vmem:[%s3328_s5 + $0x20] sm:$0xff] }
 0xae7   :  { %v846_v32 = vmul.f32 0.7978846, %v844_v31  ;;  %v2591_v33 = vpop.eup %2590 }
 0xae8   :  { %v849_v34 = vadd.f32 1.0, %v2591_v33 }
 0xae9   :  { %2592 = vtanh.f32 %v846_v32 }
 0xaea   :  { %v851_v38 = vmul.f32 %v849_v34, %v835_v36 }
 0xaef   :  { %v2593_v35 = vpop.eup %2592 }
 0xaf0   :  { %v850_v52 = vadd.f32 1.0, %v2593_v35 }
 0xaf2   :  { %v852_v39 = vmul.f32 %v850_v52, %v836_v37  ;;  %v2490_v52 = vld [vmem:[%s3328_s5 + $0x28] sm:$0xff] }
 0xaf4   :  { %v853_v40 = vpack.c.bf16 %v852_v39, %v851_v38  ;;  %v2500_v38 = vld [vmem:[%s3326_s3 + $0x78] sm:$0xff]  ;;  %v2499_v39 = vld [vmem:[%s3326_s3 + $0x70] sm:$0xff] }
 0xaf6   :  { %2241 = vmatmul.msk.bf16.vlgmr.msrb.gmra.mxu0 %vm887_vm2, %v853_v40  ;;  %v2491_v40 = vld [vmem:[%s3328_s5 + $0x30] sm:$0xff] }
 0xb73   :  { %v900_v53 = vpop.f32.mrf.mxu0 }
 0xb74   :  { %v901_v42 = vadd.f32 %v900_v53, %v862_v41 }
 0xb76   :  { %v905_v43 = vadd.f32 %v901_v42, %v795_v11 }
 0xb78   :  { %v907_v44 = vsel %vm59_vm0, %v905_v43, 0.0 }
 0xb79   :  { %908 = vadd.xlane.f32.xlu1 %v907_v44 }
 0xb7b   :  { %v902_v45 = vpop.f32.mrf.mxu0 }
 0xb7c   :  { %v903_v46 = vadd.f32 %v902_v45, %v862_v41  ;;  %v2492_v41 = vld [vmem:[%s3328_s5 + $0x38] sm:$0xff]  ;;  %v2541_v45 = vld [vmem:[%s3327_s4 + $0x4] ss:$0 sm:$0xff] }
 0xb7e   :  { %v906_v48 = vadd.f32 %v903_v46, %v796_v13 }
 0xb80   :  { %v910_v49 = vsel %vm59_vm0, %v906_v48, 0.0 }
 0xb81   :  { %911 = vadd.xlane.f32.xlu2 %v910_v49 }
 0xbec   :  { %v909_v50 = vpop.xlane.xlu1 %908 }
 0xbed   :  { %v913_v51 = vmul.f32 %v909_v50, %v2769_v10 }
 0xbef   :  { %v915_v55 = vsub.f32 %v905_v43, %v913_v51 }
 0xbf1   :  { %v917_v56 = vmul.f32 %v915_v55, %v915_v55 }
 0xbf3   :  { %v919_v57 = vsel %vm59_vm0, %v917_v56, 0.0 }
 0xbf4   :  { %v912_v58 = vpop.xlane.xlu2 %911  ;;  %920 = vadd.xlane.f32.xlu1 %v919_v57 }
 0xbf5   :  { %v914_v59 = vmul.f32 %v912_v58, %v2769_v10 }
 0xbf7   :  { %v916_v60 = vsub.f32 %v906_v48, %v914_v59 }
 0xbf9   :  { %v918_v61 = vmul.f32 %v916_v60, %v916_v60 }
 0xbfb   :  { %v922_v62 = vsel %vm59_vm0, %v918_v61, 0.0 }
 0xbfc   :  { %923 = vadd.xlane.f32.xlu2 %v922_v62 }
 0xc0d   :  { %978 = vperm.xlu1 %2532, %v2250_v63   ;;  %v2542_v63 = vld [vmem:[%s3327_s4 + $0x5] ss:$0 sm:$0xff] }
 0xc14   :  { %983 = vperm.xlu2 %2531, %v2251_v0  }
 0xc1c   :  { %998 = vperm.xlu2 %2531, %v2254_v1  }
 0xc67   :  { %v921_v3 = vpop.xlane.xlu1 %920 }
 0xc68   :  { %v925_v4 = vmul.f32 %v921_v3, %v2769_v10 }
 0xc6a   :  { %v927_v5 = vadd.f32 1e-12, %v925_v4 }
 0xc6c   :  { %2594 = vrsqrt.f32 %v927_v5  ;;  %vm935_vm4 = vweird.f32 %v927_v5 }
 0xc6f   :  { %v924_v6 = vpop.xlane.xlu2 %923 }
 0xc70   :  { %v926_v7 = vmul.f32 %v924_v6, %v2769_v10 }
 0xc72   :  { %v2595_v8 = vpop.eup %2594  ;;  %v928_v9 = vadd.f32 1e-12, %v926_v7 }
 0xc73   :  { %v930_v11 = vmul.f32 %v2595_v8, %v927_v5  ;;  %vm936_vm3 = vweird.f32 %v2595_v8 }
 0xc74   :  { %2596 = vrsqrt.f32 %v928_v9  ;;  %vm937_vm5 = vmor %vm935_vm4, %vm936_vm3  ;;  %vm945_vm7 = vweird.f32 %v928_v9  ;;  %vm1800_vm4 = vcmask 253952  }
 0xc75   :  { %v931_v13 = vmul.f32 %v2595_v8, %v930_v11 }
 0xc77   :  { %v932_v15 = vmul.f32 0.5, %v931_v13 }
 0xc79   :  { %v933_v18 = vsub.f32 1.5, %v932_v15 }
 0xc7a   :  { %v2597_v19 = vpop.eup %2596 }
 0xc7b   :  { %v934_v20 = vmul.f32 %v2595_v8, %v933_v18  ;;  %v940_v21 = vmul.f32 %v2597_v19, %v928_v9  ;;  %vm946_vm6 = vweird.f32 %v2597_v19 }
 0xc7c   :  { %vm947_vm11 = vmor %vm945_vm7, %vm946_vm6  ;;  %vm1808_vm7 = vcmask 516352  }
 0xc7d   :  { %v941_v23 = vmul.f32 %v2597_v19, %v940_v21  ;;  %v938_v24 = vsel %vm937_vm5, %v2595_v8, %v934_v20 }
 0xc7e   :  { %v949_v28 = vmul.f32 %v938_v24, %v915_v55  ;;  %v984_v55 = vpop.permute.xlu2 %983 }
 0xc7f   :  { %v942_v25 = vmul.f32 0.5, %v941_v23  ;;  %v979_v42 = vpop.permute.xlu1 %978 }
 0xc80   :  { %v952_v31 = vmul.f32 %v951_v27, %v949_v28 }
 0xc81   :  { %v943_v26 = vsub.f32 1.5, %v942_v25 }
 0xc82   :  { %v3026_v34 = vadd.f32 %v954_v30, %v952_v31 }
 0xc83   :  { %v944_v29 = vmul.f32 %v2597_v19, %v943_v26 }
 0xc85   :  { %v948_v47 = vsel %vm947_vm11, %v2597_v19, %v944_v29  ;;  %vm1816_vm11 = vcmask 778752  }
 0xc86   :  { %v950_v32 = vmul.f32 %v948_v47, %v916_v60  ;;  %v999_v54 = vpop.permute.xlu2 %998 }
 0xc88   :  { %v953_v33 = vmul.f32 %v951_v27, %v950_v32 }
 0xc8a   :  { %v3028_v35 = vadd.f32 %v954_v30, %v953_v33 }
 0xc8c   :  { %v3032_v36 = vpack.c.bf16 %v3028_v35, %v3026_v34 }
 0xc8e   :  { %2295 = vmatmul.msk.bf16.vlgmr.msra.gmra.mxu3 %vm59_vm0, %v3032_v36  ;;  %v1049_v37 = vsel %vm59_vm0, %v3032_v36, 0 }
 0xc8f   :  { %1058 = vmatpush.bf16.xpose.msrb.mxu1 %v1049_v37 }
 0xc96   :  { %2274 = vmatmul.msk.bf16.vlgmr.msrb.gmra.mxu1 %vm59_vm0, %v2489_v22  ;;  %v2255_v22 = vld [vmem:[%s3329_s6 + $0x68] sm:$0xff] }
 0xc97   :  { %1486 = vmatpush.bf16.msra.mxu1 %v2500_v38 }
 0xc9b   :  { %1487 = vmatpush.bf16.msra.mxu1 %v2499_v39  ;;  %v2253_v39 = vld [vmem:[%s3329_s6 + $0x58] sm:$0xff] }
 0xc9e   :  { %2311 = vmatmul.msk.bf16.vlgmr.msrb.gmra.mxu3 %vm59_vm0, %v3032_v36 }
 0xca6   :  { %2275 = vmatmul.msk.bf16.gmra.mxu1 %vm59_vm0, %v2490_v52 }
 0xcb6   :  { %2276 = vmatmul.msk.bf16.gmra.mxu1 %vm59_vm0, %v2491_v40 }
 0xcc6   :  { %2277 = vmatmul.msk.bf16.gmra.mxu1 %vm59_vm0, %v2492_v41 }
 0xcd6   :  { %2346 = vmatmul.msk.bf16.vlgmr.msra.gmra.mxu1 %vm59_vm0, %v3032_v36 }
 0xd11   :  { %v1124_v53 = vpop.f32.mrf.mxu3 }
 0xd12   :  { %v1125_v50 = vadd.f32 %v2541_v45, %v1124_v53  ;;  %v2252_v53 = vld [vmem:[%s3329_s6 + $0x50] sm:$0xff] }
 0xd13   :  { %v1060_v43 = vpop.f32.mrf.mxu1 }
 0xd14   :  { %v1061_v44 = vadd.f32 %v1060_v43, %v979_v42 }
 0xd16   :  { %v1080_v46 = vpack.c.bf16 %v1061_v44, %v1061_v44 }
 0xd18   :  { %v1134_v48 = vsel %vm291_vm8, %v1080_v46, 0 }
 0xd19   :  { %v1126_v49 = vpop.f32.mrf.mxu3  ;;  %1143 = vmatpush.bf16.msra.mxu2 %v1134_v48 }
 0xd1a   :  { %v1127_v51 = vadd.f32 %v2541_v45, %v1126_v49 }
 0xd1b   :  { %v1062_v56 = vpop.f32.mrf.mxu1 }
 0xd1c   :  { %v1129_v57 = vpack.c.bf16 %v1127_v51, %v1125_v50  ;;  %v1063_v58 = vadd.f32 %v1062_v56, %v984_v55 }
 0xd1e   :  { %v1081_v59 = vpack.c.bf16 %v1063_v58, %v1063_v58  ;;  %2296 = vmatmul.msk.bf16.vlgmr.msra.gmra.mxu2 %vm287_vm9, %v1129_v57  ;;  %v2279_v58 = vld [vmem:[%s3330_s7 + $0x14] sm:$0xf] }
 0xd20   :  { %v1235_v60 = vsel %vm291_vm8, %v1081_v59, 0 }
 0xd21   :  { %v1225_v61 = vpop.f32.mrf.mxu3  ;;  %1244 = vmatpush.bf16.msrb.mxu2 %v1235_v60  ;;  %v1299_v60 = vsel %vm291_vm8, %v2279_v58, 0 }
 0xd22   :  { %v1226_v1 = vadd.f32 %v2542_v63, %v1225_v61  ;;  %1308 = vmatpush.bf16.msra.mxu3 %v1299_v60  ;;  %v2256_v60 = vld [vmem:[%s3329_s6 + $0x70] sm:$0xff] }
 0xd23   :  { %v3070_v62 = vpop.f32.mrf.mxu1 }
 0xd29   :  { %v1227_v0 = vpop.f32.mrf.mxu3 }
 0xd2a   :  { %v1228_v2 = vadd.f32 %v2542_v63, %v1227_v0 }
 0xd2b   :  { %v3075_v3 = vpop.f32.mrf.mxu1 }
 0xd2c   :  { %v1230_v4 = vpack.c.bf16 %v1228_v2, %v1226_v1  ;;  %v2498_v1 = vld [vmem:[%s3326_s3 + $0x68] sm:$0xff]  ;;  %v2497_v2 = vld [vmem:[%s3326_s3 + $0x60] sm:$0xff] }
 0xd2e   :  { %2312 = vmatmul.msk.bf16.vlgmr.msrb.gmra.mxu2 %vm287_vm9, %v1230_v4 }
 0xd33   :  { %v1070_v5 = vpop.f32.mrf.mxu1 }
 0xd34   :  { %v1071_v6 = vadd.f32 %v1070_v5, %v999_v54 }
 0xd36   :  { %v1084_v7 = vpack.c.bf16 %v1071_v6, %v1071_v6 }
 0xd38   :  { %v1177_v8 = vsel %vm309_vm10, %v1084_v7, 0 }
 0xd39   :  { %1186 = vmatpush.bf16.xpose.msra.mxu0 %v1177_v8 }
 0xd3b   :  { %v1072_v56 = vpop.f32.mrf.mxu1 }
 0xda1   :  { %v1145_v9 = vpop.f32.mrf.mxu2 }
 0xda2   :  { %v1146_v11 = vadd.f32 %v1145_v9, %v2828_v12 }
 0xda4   :  { %v1150_v13 = vsel %vm309_vm10, %v1146_v11, -inf }
 0xda5   :  { %1151 = vmax.xlane.f32.xlu0 %v1150_v13 }
 0xda9   :  { %v1147_v14 = vpop.f32.mrf.mxu2 }
 0xdaa   :  { %v1148_v15 = vadd.f32 %v1147_v14, %v2835_v16 }
 0xdac   :  { %v1153_v17 = vsel %vm309_vm10, %v1148_v15, -inf }
 0xdad   :  { %1154 = vmax.xlane.f32.xlu0 %v1153_v17 }
 0xdb1   :  { %v1246_v18 = vpop.f32.mrf.mxu2 }
 0xdb2   :  { %v1247_v19 = vadd.f32 %v1246_v18, %v2828_v12 }
 0xdb4   :  { %v1251_v20 = vsel %vm309_vm10, %v1247_v19, -inf }
 0xdb5   :  { %1252 = vmax.xlane.f32.xlu1 %v1251_v20 }
 0xdb9   :  { %v1248_v21 = vpop.f32.mrf.mxu2 }
 0xdba   :  { %v1249_v23 = vadd.f32 %v1248_v21, %v2835_v16 }
 0xdbc   :  { %v1254_v24 = vsel %vm309_vm10, %v1249_v23, -inf }
 0xdbd   :  { %1255 = vmax.xlane.f32.xlu0 %v1254_v24  ;;  %v3123_v24 = vpop.f32.mrf.mxu1 }
 0xe18   :  { %v1152_v25 = vpop.xlane.xlu0 %1151 }
 0xe19   :  { %v1156_v26 = vsub.f32 %v1146_v11, %v1152_v25 }
 0xe1b   :  { %v1158_v27 = vmul.f32 1.442695, %v1156_v26 }
 0xe1d   :  { %2598 = vpow2.f32 %v1158_v27 }
 0xe20   :  { %v1155_v28 = vpop.xlane.xlu0 %1154 }
 0xe21   :  { %v1157_v29 = vsub.f32 %v1148_v15, %v1155_v28  ;;  %v3127_v28 = vpop.f32.mrf.mxu1 }
 0xe23   :  { %v2599_v47 = vpop.eup %2598  ;;  %v1160_v30 = vmul.f32 1.442695, %v1157_v29 }
 0xe24   :  { %v1162_v31 = vsel %vm309_vm10, %v2599_v47, 0.0 }
 0xe25   :  { %2600 = vpow2.f32 %v1160_v30  ;;  %1163 = vadd.xlane.f32.xlu0 %v1162_v31 }
 0xe28   :  { %v1253_v40 = vpop.xlane.xlu1 %1252 }
 0xe29   :  { %v1257_v41 = vsub.f32 %v1247_v19, %v1253_v40 }
 0xe2b   :  { %v2601_v12 = vpop.eup %2600  ;;  %v1259_v42 = vmul.f32 1.442695, %v1257_v41 }
 0xe2c   :  { %v1165_v32 = vsel %vm309_vm10, %v2601_v12, 0.0 }
 0xe2d   :  { %1166 = vadd.xlane.f32.xlu2 %v1165_v32 }
 0xe30   :  { %v1256_v16 = vpop.xlane.xlu0 %1255 }
 0xe31   :  { %v1258_v33 = vsub.f32 %v1249_v23, %v1256_v16 }
 0xe33   :  { %v1261_v37 = vmul.f32 1.442695, %v1258_v33  ;;  %v2543_v33 = vld [vmem:[%s3327_s4 + $0x7] ss:$0 sm:$0xff] }
 0xe35   :  { %2602 = vpow2.f32 %v1261_v37 }
 0xe36   :  { %2604 = vpow2.f32 %v1259_v42  ;;  %v2642_v42 = vld [vmem:[%s3324_s1] sm:$0xff] }
 0xe39   :  { %1003 = vperm.xlu0 %2533, %v2255_v22  }
 0xe3b   :  { %v2603_v52 = vpop.eup %2602 }
 0xe3c   :  { %v1266_v38 = vsel %vm309_vm10, %v2603_v52, 0.0  ;;  %v2605_v43 = vpop.eup %2604 }
 0xe3d   :  { %1267 = vadd.xlane.f32.xlu1 %v1266_v38  ;;  %v1263_v44 = vsel %vm309_vm10, %v2605_v43, 0.0 }
 0xe45   :  { %993 = vperm.xlu2 %2531, %v2253_v39  }
 0xe56   :  { %988 = vperm.xlu1 %2532, %v2252_v53  }
 0xe63   :  { %1264 = vadd.xlane.f32.xlu0 %v1263_v44 }
 0xe98   :  { %v1164_v45 = vpop.xlane.xlu0 %1163 }
 0xe99   :  { %2606 = vrcp.f32 %v1164_v45 }
 0xe9f   :  { %v2607_v48 = vpop.eup %2606 }
 0xea0   :  { %v1167_v46 = vpop.xlane.xlu2 %1166  ;;  %v1170_v50 = vmul.f32 %v2607_v48, %v2599_v47  ;;  %v2544_v47 = vld [vmem:[%s3327_s4 + $0x6] ss:$0 sm:$0xff] }
 0xea1   :  { %2608 = vrcp.f32 %v1167_v46  ;;  %v2643_v46 = vld [vmem:[%s3324_s1 + $0x8] sm:$0xff] }
 0xea7   :  { %v2609_v49 = vpop.eup %2608 }
 0xea8   :  { %v1171_v51 = vmul.f32 %v2609_v49, %v2601_v12  ;;  %v994_v20 = vpop.permute.xlu2 %993  ;;  %v1489_v12 = vpop.f32.mrf.mxu1 }
 0xea9   :  { %v1068_v23 = vadd.f32 %v3075_v3, %v994_v20  ;;  %v1490_v22 = vadd.f32 %v2543_v33, %v1489_v12 }
 0xeaa   :  { %v1172_v55 = vpack.c.bf16 %v1171_v51, %v1170_v50 }
 0xeab   :  { %v1004_v57 = vpop.permute.xlu0 %1003  ;;  %v1083_v25 = vpack.c.bf16 %v1068_v23, %v1068_v23 }
 0xeac   :  { %v1073_v59 = vadd.f32 %v1072_v56, %v1004_v57  ;;  %2297 = vmatmul.msk.bf16.vlgmr.msra.gmra.mxu0 %vm309_vm10, %v1172_v55 }
 0xead   :  { %v1499_v27 = vsel %vm291_vm8, %v1083_v25, 0 }
 0xeae   :  { %v1085_v61 = vpack.c.bf16 %v1073_v59, %v1073_v59  ;;  %v2257_v59 = vld [vmem:[%s3329_s6 + $0x78] sm:$0xff] }
 0xeb0   :  { %v1278_v63 = vsel %vm309_vm10, %v1085_v61, 0  ;;  %v1268_v0 = vpop.xlane.xlu1 %1267  ;;  %v1491_v16 = vpop.f32.mrf.mxu1 }
 0xeb1   :  { %1287 = vmatpush.bf16.xpose.msrb.mxu0 %v1278_v63  ;;  %2610 = vrcp.f32 %v1268_v0  ;;  %v1492_v37 = vadd.f32 %v2543_v33, %v1491_v16 }
 0xeb7   :  { %v2611_v8 = vpop.eup %2610 }
 0xeb8   :  { %v1272_v11 = vmul.f32 %v2611_v8, %v2603_v52  ;;  %v1494_v52 = vpack.c.bf16 %v1492_v37, %v1490_v22 }
 0xeb9   :  { %1363 = vmatpush.bf16.msra.mxu0 %v2498_v1 }
 0xebd   :  { %1364 = vmatpush.bf16.msra.mxu0 %v2497_v2 }
 0xec8   :  { %v989_v4 = vpop.permute.xlu1 %988 }
 0xec9   :  { %v1066_v54 = vadd.f32 %v3070_v62, %v989_v4  ;;  %v2278_v62 = vld [vmem:[%s3330_s7 + $0x10] sm:$0xf] }
 0xeca   :  { %v1319_v15 = vsel %vm291_vm8, %v2278_v62, 0 }
 0xecb   :  { %v1082_v5 = vpack.c.bf16 %v1066_v54, %v1066_v54  ;;  %1328 = vmatpush.bf16.msra.mxu2 %v1319_v15 }
 0xecd   :  { %v1376_v6 = vsel %vm291_vm8, %v1082_v5, 0 }
 0xece   :  { %1385 = vmatpush.bf16.msrb.mxu3 %v1376_v6 }
 0xed6   :  { %v1265_v7 = vpop.xlane.xlu0 %1264 }
 0xed7   :  { %2612 = vrcp.f32 %v1265_v7 }
 0xedd   :  { %v2613_v9 = vpop.eup %2612 }
 0xede   :  { %v1271_v13 = vmul.f32 %v2613_v9, %v2605_v43 }
 0xee0   :  { %v1273_v14 = vpack.c.bf16 %v1272_v11, %v1271_v13 }
 0xee2   :  { %2313 = vmatmul.msk.bf16.vlgmr.msrb.gmra.mxu0 %vm309_vm10, %v1273_v14 }
 0xef2   :  { %2329 = vmatmul.msk.bf16.vlgmr.msra.gmra.mxu0 %vm59_vm0, %v3032_v36 }
 0xf29   :  { %v1188_v17 = vpop.f32.mrf.mxu0 }
 0xf31   :  { %v1190_v18 = vpop.f32.mrf.mxu0 }
 0xf32   :  { %v1193_v19 = vpack.c.bf16 %v1190_v18, %v1188_v17 }
 0xf34   :  { %2315 = vmatmul.msk.bf16.vlgmr.msra.gmra.mxu2 %vm287_vm9, %v1193_v19 }
 0xf5f   :  { %v1289_v21 = vpop.f32.mrf.mxu0 }
 0xf67   :  { %v1291_v36 = vpop.f32.mrf.mxu0 }
 0xf68   :  { %v1294_v26 = vpack.c.bf16 %v1291_v36, %v1289_v21 }
 0xf6a   :  { %2314 = vmatmul.msk.bf16.vlgmr.msra.gmra.mxu3 %vm287_vm9, %v1294_v26 }
 0xf6b   :  { %1508 = vmatpush.bf16.msra.mxu3 %v1499_v27 }
 0xf6f   :  { %v1366_v29 = vpop.f32.mrf.mxu0 }
 0xf70   :  { %v1367_v31 = vadd.f32 %v2544_v47, %v1366_v29 }
 0xf77   :  { %v1368_v30 = vpop.f32.mrf.mxu0 }
 0xf78   :  { %v1369_v3 = vadd.f32 %v2544_v47, %v1368_v30 }
 0xf7a   :  { %v1371_v32 = vpack.c.bf16 %v1369_v3, %v1367_v31 }
 0xf7c   :  { %2330 = vmatmul.msk.bf16.vlgmr.msrb.gmra.mxu3 %vm287_vm9, %v1371_v32 }
 0xf8c   :  { %2347 = vmatmul.msk.bf16.vlgmr.msra.gmra.mxu3 %vm287_vm9, %v1494_v52 }
 0xfb7   :  { %v1330_v38 = vpop.f32.mrf.mxu2 }
 0xfed   :  { %v1310_v39 = vpop.f32.mrf.mxu3 }
 0xfee   :  { %v3137_v40 = vadd.f32 %v1330_v38, %v1310_v39  ;;  %v2280_v39 = vld [vmem:[%s3330_s7 + $0x18] sm:$0xf] }
 0xff5   :  { %v3139_v41 = vpop.f32.mrf.mxu3 }
 0xfff   :  { %v1387_v53 = vpop.f32.mrf.mxu3 }
0x1000   :  { %v1388_v43 = vadd.f32 %v2642_v42, %v1387_v53  ;;  %v1440_v53 = vsel %vm291_vm8, %v2280_v39, 0 }
0x1001   :  { %1449 = vmatpush.bf16.msrb.mxu0 %v1440_v53 }
0x1002   :  { %v1392_v44 = vsel %vm309_vm10, %v1388_v43, -inf }
0x1003   :  { %1393 = vmax.xlane.f32.xlu1 %v1392_v44  ;;  %v1332_v44 = vpop.f32.mrf.mxu2 }
0x1007   :  { %v1389_v45 = vpop.f32.mrf.mxu3 }
0x1008   :  { %v1390_v48 = vadd.f32 %v2643_v46, %v1389_v45 }
0x100a   :  { %v1395_v49 = vsel %vm309_vm10, %v1390_v48, -inf }
0x100b   :  { %1396 = vmax.xlane.f32.xlu2 %v1395_v49 }
0x100f   :  { %v1510_v50 = vpop.f32.mrf.mxu3 }
0x1010   :  { %v1511_v51 = vadd.f32 %v2642_v42, %v1510_v50  ;;  %v2281_v42 = vld [vmem:[%s3330_s7 + $0x1c] sm:$0xf] }
0x1012   :  { %v1515_v55 = vsel %vm309_vm10, %v1511_v51, -inf }
0x1013   :  { %1516 = vmax.xlane.f32.xlu0 %v1515_v55 }
0x1017   :  { %v1512_v56 = vpop.f32.mrf.mxu3 }
0x1018   :  { %v1513_v57 = vadd.f32 %v2643_v46, %v1512_v56 }
0x101a   :  { %v1518_v58 = vsel %vm309_vm10, %v1513_v57, -inf }
0x101b   :  { %1519 = vmax.xlane.f32.xlu0 %v1518_v58 }
0x1023   :  { %1013 = vperm.xlu2 %2531, %v2257_v59  }
0x102f   :  { %1008 = vperm.xlu0 %2533, %v2256_v60  }
0x1076   :  { %v1394_v61 = vpop.xlane.xlu1 %1393 }
0x1077   :  { %v1398_v63 = vsub.f32 %v1388_v43, %v1394_v61  ;;  %v1563_v43 = vsel %vm291_vm8, %v2281_v42, 0 }
0x1078   :  { %1572 = vmatpush.bf16.msra.mxu0 %v1563_v43 }
0x1079   :  { %v1400_v0 = vmul.f32 1.442695, %v1398_v63 }
0x107b   :  { %2614 = vpow2.f32 %v1400_v0  ;;  %v1333_v0 = vadd.f32 %v1332_v44, %v3139_v41 }
0x107e   :  { %v1397_v1 = vpop.xlane.xlu2 %1396 }
0x107f   :  { %v1399_v2 = vsub.f32 %v1390_v48, %v1397_v1 }
0x1081   :  { %v2615_v4 = vpop.eup %2614  ;;  %v1402_v54 = vmul.f32 1.442695, %v1399_v2 }
0x1082   :  { %v1404_v5 = vsel %vm309_vm10, %v2615_v4, 0.0 }
0x1083   :  { %2616 = vpow2.f32 %v1402_v54  ;;  %1405 = vadd.xlane.f32.xlu0 %v1404_v5 }
0x1086   :  { %v1517_v6 = vpop.xlane.xlu0 %1516  ;;  %v1014_v20 = vpop.permute.xlu2 %1013 }
0x1087   :  { %v1521_v7 = vsub.f32 %v1511_v51, %v1517_v6  ;;  %v1078_v21 = vadd.f32 %v3127_v28, %v1014_v20 }
0x1089   :  { %v2617_v8 = vpop.eup %2616  ;;  %v1523_v9 = vmul.f32 1.442695, %v1521_v7  ;;  %v1087_v36 = vpack.c.bf16 %v1078_v21, %v1078_v21  ;;  %v2501_v21 = vld [vmem:[%s3331_s8 + $0x10] sm:$0xff] }
0x108a   :  { %v1407_v11 = vsel %vm309_vm10, %v2617_v8, 0.0 }
0x108b   :  { %2618 = vpow2.f32 %v1523_v9  ;;  %1408 = vadd.xlane.f32.xlu1 %v1407_v11  ;;  %v1542_v29 = vsel %vm309_vm10, %v1087_v36, 0 }
0x108e   :  { %v1520_v13 = vpop.xlane.xlu0 %1519 }
0x108f   :  { %v1522_v14 = vsub.f32 %v1513_v57, %v1520_v13  ;;  %v3180_v57 = vld [vmem:[%s3334_s11 + $0x8] sm:$0x3f] }
0x1090   :  { %v1585_v61 = vperm.slane %v3180_v57, 0 }
0x1091   :  { %v2619_v62 = vpop.eup %2618  ;;  %v1525_v15 = vmul.f32 1.442695, %v1522_v14 }
0x1092   :  { %v1527_v17 = vsel %vm309_vm10, %v2619_v62, 0.0 }
0x1093   :  { %2620 = vpow2.f32 %v1525_v15  ;;  %1528 = vadd.xlane.f32.xlu1 %v1527_v17 }
0x1099   :  { %v2621_v18 = vpop.eup %2620 }
0x109a   :  { %v1530_v19 = vsel %vm309_vm10, %v2621_v18, 0.0 }
0x109b   :  { %1531 = vadd.xlane.f32.xlu1 %v1530_v19 }
0x10a1   :  { %v1009_v23 = vpop.permute.xlu0 %1008 }
0x10a2   :  { %v1076_v25 = vadd.f32 %v3123_v24, %v1009_v23 }
0x10a4   :  { %v1086_v26 = vpack.c.bf16 %v1076_v25, %v1076_v25 }
0x10a6   :  { %v1419_v27 = vsel %vm309_vm10, %v1086_v26, 0 }
0x10a7   :  { %1428 = vmatpush.bf16.xpose.msrb.mxu2 %v1419_v27 }
0x10af   :  { %1551 = vmatpush.bf16.xpose.msra.mxu2 %v1542_v29 }
0x10f6   :  { %v1406_v47 = vpop.xlane.xlu0 %1405 }
0x10f7   :  { %2622 = vrcp.f32 %v1406_v47 }
0x10fd   :  { %v2623_v31 = vpop.eup %2622 }
0x10fe   :  { %v1409_v30 = vpop.xlane.xlu1 %1408  ;;  %v1412_v12 = vmul.f32 %v2623_v31, %v2615_v4 }
0x10ff   :  { %2624 = vrcp.f32 %v1409_v30 }
0x1105   :  { %v2625_v3 = vpop.eup %2624 }
0x1106   :  { %v1413_v32 = vmul.f32 %v2625_v3, %v2617_v8  ;;  %v1529_v28 = vpop.xlane.xlu1 %1528 }
0x1107   :  { %2626 = vrcp.f32 %v1529_v28 }
0x1108   :  { %v1414_v16 = vpack.c.bf16 %v1413_v32, %v1412_v12 }
0x110a   :  { %2331 = vmatmul.msk.bf16.vlgmr.msrb.gmra.mxu2 %vm309_vm10, %v1414_v16 }
0x110d   :  { %v2627_v33 = vpop.eup %2626 }
0x110e   :  { %v1532_v24 = vpop.xlane.xlu1 %1531  ;;  %v1535_v22 = vmul.f32 %v2627_v33, %v2619_v62  ;;  %v1632_v33 = vperm.slane %v3180_v57, 2 }
0x110f   :  { %2628 = vrcp.f32 %v1532_v24 }
0x1115   :  { %v2629_v37 = vpop.eup %2628 }
0x1116   :  { %v1536_v52 = vmul.f32 %v2629_v37, %v2621_v18 }
0x1118   :  { %v1537_v38 = vpack.c.bf16 %v1536_v52, %v1535_v22 }
0x111a   :  { %2348 = vmatmul.msk.bf16.vlgmr.msra.gmra.mxu2 %vm309_vm10, %v1537_v38  ;;  %v1635_v38 = vperm.slane %v3180_v57, 3 }
0x118d   :  { %v1430_v45 = vpop.f32.mrf.mxu2 }
0x1195   :  { %v1432_v46 = vpop.f32.mrf.mxu2 }
0x1196   :  { %v1435_v48 = vpack.c.bf16 %v1432_v46, %v1430_v45  ;;  %v2506_v46 = vld [vmem:[%s3333_s10 + $0x38] sm:$0xff] }
0x1197   :  { %1738 = vmatpush.bf16.msrb.mxu3 %v2506_v46 }
0x1198   :  { %2332 = vmatmul.msk.bf16.vlgmr.msrb.gmra.mxu0 %vm287_vm9, %v1435_v48  ;;  %v2505_v48 = vld [vmem:[%s3333_s10 + $0x30] sm:$0xff] }
0x119b   :  { %1739 = vmatpush.bf16.msrb.mxu3 %v2505_v48 }
0x119d   :  { %v1553_v49 = vpop.f32.mrf.mxu2 }
0x11a5   :  { %v1555_v50 = vpop.f32.mrf.mxu2 }
0x11a6   :  { %v1558_v51 = vpack.c.bf16 %v1555_v50, %v1553_v49  ;;  %v2504_v49 = vld [vmem:[%s3333_s10 + $0x28] sm:$0xff]  ;;  %v2503_v50 = vld [vmem:[%s3333_s10 + $0x20] sm:$0xff]  ;;  %s2673_s10 = smov 64  }
0x11a7   :  { %1740 = vmatpush.bf16.msrb.mxu3 %v2504_v49  ;;  %v1797_v49 = vperm.slane %v3180_v57, 5 }
0x11a8   :  { %2349 = vmatmul.msk.bf16.vlgmr.msra.gmra.mxu0 %vm287_vm9, %v1558_v51  ;;  %v2545_v51 = vld [vmem:[%s3332_s9 + $0x1] ss:$0 sm:$0xff]  ;;  %s2672_s9 = smov 32  }
0x11ab   :  { %1741 = vmatpush.bf16.msrb.mxu3 %v2503_v50 }
0x1215   :  { %v1451_v55 = vpop.f32.mrf.mxu0 }
0x1216   :  { %v1456_v58 = vadd.f32 %v1451_v55, %v3137_v40 }
0x121d   :  { %v1453_v56 = vpop.f32.mrf.mxu0 }
0x121e   :  { %v1457_v2 = vadd.f32 %v1453_v56, %v1333_v0 }
0x1225   :  { %v1574_v59 = vpop.f32.mrf.mxu0 }
0x1226   :  { %v1579_v60 = vadd.f32 %v1574_v59, %v1456_v58 }
0x1228   :  { %v1583_v63 = vadd.f32 %v1579_v60, %v3026_v34 }
0x122a   :  { %v1586_v1 = vadd.f32 %v1585_v61, %v1583_v63 }
0x122c   :  { %v1588_v4 = vsel %vm59_vm0, %v1586_v1, 0.0 }
0x122d   :  { %1589 = vadd.xlane.f32.xlu1 %v1588_v4  ;;  %v1576_v54 = vpop.f32.mrf.mxu0 }
0x122e   :  { %v1580_v5 = vadd.f32 %v1576_v54, %v1457_v2 }
0x1230   :  { %v1584_v6 = vadd.f32 %v1580_v5, %v3028_v35  ;;  %v2502_v35 = vld [vmem:[%s3331_s8 + $0x18] sm:$0xff]  ;;  %s2675_s8 = smov [#allocation3]  }
0x1231   :  { %1670 = vmatpush.bf16.msrb.mxu1 %v2502_v35 }
0x1232   :  { %v1587_v7 = vadd.f32 %v1585_v61, %v1584_v6 }
0x1234   :  { %v1591_v40 = vsel %vm59_vm0, %v1587_v7, 0.0 }
0x1235   :  { %1592 = vadd.xlane.f32.xlu2 %v1591_v40  ;;  %1671 = vmatpush.bf16.msrb.mxu1 %v2501_v21 }
0x12a0   :  { %v1590_v8 = vpop.xlane.xlu1 %1589 }
0x12a1   :  { %v1594_v9 = vmul.f32 %v1590_v8, %v2769_v10 }
0x12a3   :  { %v1596_v11 = vsub.f32 %v1586_v1, %v1594_v9 }
0x12a5   :  { %v1598_v34 = vmul.f32 %v1596_v11, %v1596_v11 }
0x12a7   :  { %v1600_v41 = vsel %vm59_vm0, %v1598_v34, 0.0 }
0x12a8   :  { %1601 = vadd.xlane.f32.xlu1 %v1600_v41  ;;  %v1593_v13 = vpop.xlane.xlu2 %1592 }
0x12a9   :  { %v1595_v14 = vmul.f32 %v1593_v13, %v2769_v10 }
0x12ab   :  { %v1597_v62 = vsub.f32 %v1587_v7, %v1595_v14 }
0x12ad   :  { %v1599_v15 = vmul.f32 %v1597_v62, %v1597_v62 }
0x12af   :  { %v1603_v17 = vsel %vm59_vm0, %v1599_v15, 0.0 }
0x12b0   :  { %1604 = vadd.xlane.f32.xlu0 %v1603_v17 }
0x131b   :  { %v1602_v18 = vpop.xlane.xlu1 %1601 }
0x131c   :  { %v1606_v19 = vmul.f32 %v1602_v18, %v2769_v10 }
0x131e   :  { %v1608_v20 = vadd.f32 1e-12, %v1606_v19 }
0x1320   :  { %2630 = vrsqrt.f32 %v1608_v20  ;;  %vm1616_vm9 = vweird.f32 %v1608_v20 }
0x1323   :  { %v1605_v23 = vpop.xlane.xlu0 %1604 }
0x1324   :  { %v1607_v25 = vmul.f32 %v1605_v23, %v2769_v10 }
0x1326   :  { %v2631_v36 = vpop.eup %2630  ;;  %v1609_v26 = vadd.f32 1e-12, %v1607_v25 }
0x1327   :  { %v1611_v27 = vmul.f32 %v2631_v36, %v1608_v20  ;;  %vm1617_vm8 = vweird.f32 %v2631_v36 }
0x1328   :  { %2632 = vrsqrt.f32 %v1609_v26  ;;  %vm1618_vm10 = vmor %vm1616_vm9, %vm1617_vm8  ;;  %vm1626_vm13 = vweird.f32 %v1609_v26  ;;  %vm1826_vm8 = vcmask 1041152  }
0x1329   :  { %v1612_v29 = vmul.f32 %v2631_v36, %v1611_v27 }
0x132b   :  { %v1613_v47 = vmul.f32 0.5, %v1612_v29 }
0x132d   :  { %v1614_v30 = vsub.f32 1.5, %v1613_v47 }
0x132e   :  { %v2633_v31 = vpop.eup %2632 }
0x132f   :  { %v1615_v3 = vmul.f32 %v2631_v36, %v1614_v30  ;;  %v1621_v12 = vmul.f32 %v2633_v31, %v1609_v26  ;;  %vm1627_vm12 = vweird.f32 %v2633_v31 }
0x1330   :  { %vm1628_vm14 = vmor %vm1626_vm13, %vm1627_vm12 }
0x1331   :  { %v1622_v32 = vmul.f32 %v2633_v31, %v1621_v12  ;;  %v1619_v28 = vsel %vm1618_vm10, %v2631_v36, %v1615_v3 }
0x1332   :  { %v1630_v37 = vmul.f32 %v1619_v28, %v1596_v11 }
0x1333   :  { %v1623_v16 = vmul.f32 0.5, %v1622_v32 }
0x1334   :  { %v1633_v39 = vmul.f32 %v1632_v33, %v1630_v37 }
0x1335   :  { %v1624_v24 = vsub.f32 1.5, %v1623_v16 }
0x1336   :  { %v1636_v43 = vadd.f32 %v1635_v38, %v1633_v39 }
0x1337   :  { %v1625_v22 = vmul.f32 %v2633_v31, %v1624_v24 }
0x1339   :  { %v1629_v52 = vsel %vm1628_vm14, %v2633_v31, %v1625_v22 }
0x133a   :  { %v1631_v53 = vmul.f32 %v1629_v52, %v1597_v62  ;;  %v1706_v62 = vperm.slane %v3180_v57, 1 }
0x133c   :  { %v1634_v42 = vmul.f32 %v1632_v33, %v1631_v53 }
0x133e   :  { %v1637_v44 = vadd.f32 %v1635_v38, %v1634_v42 }
0x1340   :  { %v1638_v45 = vpack.c.bf16 %v1637_v44, %v1636_v43 }
0x1342   :  { %2364 = vmatmul.msk.bf16.vlgmr.msrb.gmra.mxu1 %vm59_vm0, %v1638_v45  ;;  %v1794_v45 = vperm.slane %v3180_v57, 4 }
0x13bf   :  { %v1673_v55 = vpop.f32.mrf.mxu1 }
0x13c0   :  { %v1674_v56 = vadd.f32 %v2545_v51, %v1673_v55 }
0x13c2   :  { %v1680_v58 = vmul.f32 0.044715, %v1674_v56  ;;  %v1678_v9 = vmul.f32 0.5, %v1674_v56 }
0x13c4   :  { %v1682_v59 = vmul.f32 %v1680_v58, %v1674_v56 }
0x13c6   :  { %v1684_v60 = vmul.f32 %v1682_v59, %v1674_v56 }
0x13c7   :  { %v1675_v61 = vpop.f32.mrf.mxu1 }
0x13c8   :  { %v1686_v63 = vadd.f32 %v1684_v60, %v1674_v56  ;;  %v1676_v0 = vadd.f32 %v2545_v51, %v1675_v61 }
0x13ca   :  { %v1681_v1 = vmul.f32 0.044715, %v1676_v0  ;;  %v1688_v2 = vmul.f32 0.7978846, %v1686_v63  ;;  %v1679_v11 = vmul.f32 0.5, %v1676_v0 }
0x13cc   :  { %v1683_v4 = vmul.f32 %v1681_v1, %v1676_v0  ;;  %2634 = vtanh.f32 %v1688_v2 }
0x13ce   :  { %v1685_v54 = vmul.f32 %v1683_v4, %v1676_v0 }
0x13d0   :  { %v1687_v5 = vadd.f32 %v1685_v54, %v1676_v0 }
0x13d2   :  { %v1689_v6 = vmul.f32 0.7978846, %v1687_v5  ;;  %v2635_v7 = vpop.eup %2634 }
0x13d3   :  { %v1692_v40 = vadd.f32 1.0, %v2635_v7 }
0x13d4   :  { %2636 = vtanh.f32 %v1689_v6 }
0x13d5   :  { %v1694_v41 = vmul.f32 %v1692_v40, %v1678_v9 }
0x13da   :  { %v2637_v8 = vpop.eup %2636 }
0x13db   :  { %v1693_v34 = vadd.f32 1.0, %v2637_v8 }
0x13dd   :  { %v1695_v13 = vmul.f32 %v1693_v34, %v1679_v11 }
0x13df   :  { %v1696_v14 = vpack.c.bf16 %v1695_v13, %v1694_v41 }
0x13e1   :  { %2389 = vmatmul.msk.bf16.vlgmr.msrb.gmra.mxu3 %vm887_vm2, %v1696_v14 }
0x1464   :  { %v1743_v15 = vpop.f32.mrf.mxu3 }
0x1465   :  { %v1744_v17 = vadd.f32 %v1743_v15, %v1706_v62 }
0x1467   :  { %v1748_v35 = vadd.f32 %v1744_v17, %v1636_v43 }
0x1469   :  { %v1750_v18 = vsel %vm59_vm0, %v1748_v35, 0.0 }
0x146a   :  { %1751 = vadd.xlane.f32.xlu1 %v1750_v18 }
0x146c   :  { %v1745_v19 = vpop.f32.mrf.mxu3 }
0x146d   :  { %v1746_v20 = vadd.f32 %v1745_v19, %v1706_v62 }
0x146f   :  { %v1749_v21 = vadd.f32 %v1746_v20, %v1637_v44 }
0x1471   :  { %v1753_v23 = vsel %vm59_vm0, %v1749_v21, 0.0 }
0x1472   :  { %1754 = vadd.xlane.f32.xlu1 %v1753_v23 }
0x14dd   :  { %v1752_v25 = vpop.xlane.xlu1 %1751 }
0x14de   :  { %v1756_v36 = vmul.f32 %v1752_v25, %v2769_v10 }
0x14e0   :  { %v1758_v26 = vsub.f32 %v1748_v35, %v1756_v36 }
0x14e2   :  { %v1760_v27 = vmul.f32 %v1758_v26, %v1758_v26 }
0x14e4   :  { %v1762_v29 = vsel %vm59_vm0, %v1760_v27, 0.0  ;;  %v2522_v27 = vld [vmem:[%s3335_s12 + $0x78] sm:$0xff] }
0x14e5   :  { %1763 = vadd.xlane.f32.xlu0 %v1762_v29  ;;  %v1755_v47 = vpop.xlane.xlu1 %1754  ;;  %2066 = vmatpush.bf16.msrb.mxu0 %v2522_v27  ;;  %v2513_v29 = vld [vmem:[%s3335_s12 + $0x30] sm:$0xff] }
0x14e6   :  { %v1757_v30 = vmul.f32 %v1755_v47, %v2769_v10  ;;  %v2521_v47 = vld [vmem:[%s3335_s12 + $0x70] sm:$0xff] }
0x14e8   :  { %v1759_v31 = vsub.f32 %v1749_v21, %v1757_v30  ;;  %v2512_v30 = vld [vmem:[%s3335_s12 + $0x28] sm:$0xff] }
0x14e9   :  { %2067 = vmatpush.bf16.msrb.mxu0 %v2521_v47 }
0x14ea   :  { %v1761_v3 = vmul.f32 %v1759_v31, %v1759_v31 }
0x14ec   :  { %v1765_v12 = vsel %vm59_vm0, %v1761_v3, 0.0  ;;  %v2511_v3 = vld [vmem:[%s3335_s12 + $0x20] sm:$0xff] }
0x14ed   :  { %1766 = vadd.xlane.f32.xlu0 %v1765_v12  ;;  %v2519_v12 = vld [vmem:[%s3335_s12 + $0x60] sm:$0xff] }
0x1558   :  { %v1764_v32 = vpop.xlane.xlu0 %1763 }
0x1559   :  { %v1768_v28 = vmul.f32 %v1764_v32, %v2769_v10  ;;  %v2510_v32 = vld [vmem:[%s3335_s12 + $0x18] sm:$0xff] }
0x155b   :  { %v1770_v16 = vadd.f32 1e-12, %v1768_v28  ;;  %v2518_v28 = vld [vmem:[%s3335_s12 + $0x58] sm:$0xff] }
0x155d   :  { %2638 = vrsqrt.f32 %v1770_v16  ;;  %vm1778_vm1 = vweird.f32 %v1770_v16 }
0x1560   :  { %v1767_v24 = vpop.xlane.xlu0 %1766 }
0x1561   :  { %v1769_v33 = vmul.f32 %v1767_v24, %v2769_v10  ;;  %v2517_v24 = vld [vmem:[%s3335_s12 + $0x50] sm:$0xff] }
0x1563   :  { %v2639_v37 = vpop.eup %2638  ;;  %v1771_v22 = vadd.f32 1e-12, %v1769_v33  ;;  %v2508_v33 = vld [vmem:[%s3335_s12 + $0x8] sm:$0xff] }
0x1564   :  { %v1773_v52 = vmul.f32 %v2639_v37, %v1770_v16  ;;  %vm1779_vm15 = vweird.f32 %v2639_v37  ;;  %v2509_v16 = vld [vmem:[%s3335_s12 + $0x10] sm:$0xff] }
0x1565   :  { %2640 = vrsqrt.f32 %v1771_v22  ;;  %vm1780_vm2 = vmor %vm1778_vm1, %vm1779_vm15  ;;  %vm1788_vm5 = vweird.f32 %v1771_v22 }
0x1566   :  { %v1774_v38 = vmul.f32 %v2639_v37, %v1773_v52  ;;  %v2515_v52 = vld [vmem:[%s3335_s12 + $0x40] sm:$0xff] }
0x1568   :  { %v1775_v39 = vmul.f32 0.5, %v1774_v38 }
0x156a   :  { %v1776_v53 = vsub.f32 1.5, %v1775_v39 }
0x156b   :  { %v2641_v42 = vpop.eup %2640 }
0x156c   :  { %v1777_v43 = vmul.f32 %v2639_v37, %v1776_v53  ;;  %v1783_v44 = vmul.f32 %v2641_v42, %v1771_v22  ;;  %vm1789_vm3 = vweird.f32 %v2641_v42  ;;  %v2507_v22 = vld [vmem:[%s3335_s12] sm:$0xff] }
0x156d   :  { %vm1790_vm6 = vmor %vm1788_vm5, %vm1789_vm3 }
0x156e   :  { %v1781_v46 = vsel %vm1780_vm2, %v2639_v37, %v1777_v43  ;;  %v1784_v48 = vmul.f32 %v2641_v42, %v1783_v44  ;;  %v2516_v37 = vld [vmem:[%s3335_s12 + $0x48] sm:$0xff] }
0x156f   :  { %v1792_v10 = vmul.f32 %v1781_v46, %v1758_v26  ;;  %v2514_v26 = vld [vmem:[%s3335_s12 + $0x38] sm:$0xff] }
0x1570   :  { %v1785_v50 = vmul.f32 0.5, %v1784_v48  ;;  %2053 = vmatpush.bf16.msrb.mxu2 %v2514_v26 }
0x1571   :  { %v1795_v51 = vmul.f32 %v1794_v45, %v1792_v10  ;;  %v2523_v10 = vld [vmem:[%s3337_s14] sm:$0xff] }
0x1572   :  { %v1786_v55 = vsub.f32 1.5, %v1785_v50 }
0x1573   :  { %v1798_v56 = vadd.f32 %v1797_v49, %v1795_v51  ;;  %v2546_v51 = vld [vmem:[%s3336_s13] ss:$0 sm:$0xff] }
0x1574   :  { %v1787_v58 = vmul.f32 %v2641_v42, %v1786_v55  ;;  %2054 = vmatpush.bf16.msrb.mxu2 %v2513_v29 }
0x1575   :  { %1810 = vst.sshfl [vmem:[#allocation1] sm:$0xff pattern:$0x73625140] %v1798_v56  ;;  %v2390_v59 = vrot.slane %v1798_v56, 9 }
0x1576   :  { %v1791_v60 = vsel %vm1790_vm6, %v2641_v42, %v1787_v58  ;;  %1801 = vst.msk [vmem:[#allocation2] sm:$0x1] %vm1800_vm4, %v1798_v56 }
0x1577   :  { %v1793_v61 = vmul.f32 %v1791_v60, %v1759_v31  ;;  %1805 = vrot.lane.b32.xlu1 %v2390_v59, %s2672_s9  ;;  %v2520_v31 = vld [vmem:[%s3335_s12 + $0x68] sm:$0xff] }
0x1578   :  { %2055 = vmatpush.bf16.msrb.mxu2 %v2512_v30  ;;  %2068 = vmatpush.bf16.msrb.mxu0 %v2520_v31 }
0x1579   :  { %v1796_v57 = vmul.f32 %v1794_v45, %v1793_v61 }
0x157b   :  { %v1799_v63 = vadd.f32 %v1797_v49, %v1796_v57  ;;  %v2524_v49 = vld [vmem:[%s3337_s14 + $0x8] sm:$0xff]  ;;  %v2547_v57 = vld [vmem:[%s3338_s15] ss:$0 sm:$0xff]  ;;  %s2122_s14 = sshll.u32 %s2675_s8, 4  ;;  %s2123_s14 = int_to_ptr.vmem [resolvable:$true] %s2122_s14 }
0x157c   :  { %v1812_v0 = vld [vmem:[#allocation1 + $0x1] ss:$4 sm:$0xff]  ;;  %2056 = vmatpush.bf16.msrb.mxu2 %v2511_v3  ;;  %2069 = vmatpush.bf16.msrb.mxu0 %v2519_v12 }
0x157d   :  { %1813 = vrot.lane.b32.xlu0 %v1812_v0, %s2673_s10  ;;  %1818 = vst.sshfl [vmem:[#allocation1] sm:$0xff pattern:$0x73625140] %v1798_v56  ;;  %v2394_v1 = vrot.slane %v1799_v63, 9  ;;  %2109 = vmatpush.bf16.msra.mxu1 %v2524_v49 }
0x157e   :  { %1858 = vst.msk [vmem:[#allocation2 + $0x1] sm:$0x1] %vm1800_vm4, %v1799_v63 }
0x157f   :  { %1862 = vrot.lane.b32.xlu2 %v2394_v1, %s2672_s9 }
0x1580   :  { %2057 = vmatpush.bf16.msrb.mxu2 %v2510_v32  ;;  %2070 = vmatpush.bf16.msrb.mxu0 %v2518_v28 }
0x1581   :  { %2110 = vmatpush.bf16.msra.mxu1 %v2523_v10 }
0x1584   :  { %v1820_v2 = vld [vmem:[#allocation1 + $0x1] ss:$4 sm:$0xff]  ;;  %2058 = vmatpush.bf16.msrb.mxu2 %v2509_v16  ;;  %2071 = vmatpush.bf16.msrb.mxu0 %v2517_v24 }
0x1585   :  { %v2391_v4 = vrot.slane %v1820_v2, 9  ;;  %1828 = vst.sshfl [vmem:[#allocation1] sm:$0xff pattern:$0x73625140] %v1798_v56 }
0x1587   :  { %1823 = vrot.lane.b32.xlu1 %v2391_v4, %s2674_s26 }
0x1588   :  { %2059 = vmatpush.bf16.msrb.mxu2 %v2508_v33  ;;  %2072 = vmatpush.bf16.msrb.mxu0 %v2516_v37 }
0x158c   :  { %v1830_v54 = vld [vmem:[#allocation1 + $0x2] ss:$4 sm:$0xff]  ;;  %2060 = vmatpush.bf16.msrb.mxu2 %v2507_v22  ;;  %2073 = vmatpush.bf16.msrb.mxu0 %v2515_v52 }
0x158d   :  { %1833 = vst.sshfl [vmem:[#allocation1] sm:$0xff pattern:$0x73625140] %v1798_v56 }
0x158e   :  { %1832 = vst.msk [vmem:[#allocation2 + $0x2] sm:$0x1] %vm1800_vm4, %v1830_v54 }
0x1594   :  { %v1835_v5 = vld [vmem:[#allocation1 + $0x2] ss:$4 sm:$0xff] }
0x1595   :  { %v2392_v6 = vrot.slane %v1835_v5, 9  ;;  %1842 = vst.sshfl [vmem:[#allocation1] sm:$0xff pattern:$0x73625140] %v1798_v56 }
0x1597   :  { %1838 = vrot.lane.b32.xlu0 %v2392_v6, %s2672_s9 }
0x159c   :  { %v1844_v7 = vld [vmem:[#allocation1 + $0x3] ss:$4 sm:$0xff] }
0x159d   :  { %1849 = vst.sshfl [vmem:[#allocation1] sm:$0xff pattern:$0x73625140] %v1798_v56  ;;  %1845 = vrot.lane.b32.xlu1 %v1844_v7, %s2673_s10 }
0x15a4   :  { %v1851_v40 = vld [vmem:[#allocation1 + $0x3] ss:$4 sm:$0xff] }
0x15a5   :  { %1866 = vst.sshfl [vmem:[#allocation1] sm:$0xff pattern:$0x73625140] %v1799_v63  ;;  %v2393_v9 = vrot.slane %v1851_v40, 9 }
0x15ac   :  { %v1868_v8 = vld [vmem:[#allocation1 + $0x1] ss:$4 sm:$0xff] }
0x15ad   :  { %1873 = vst.sshfl [vmem:[#allocation1] sm:$0xff pattern:$0x73625140] %v1799_v63  ;;  %1869 = vrot.lane.b32.xlu2 %v1868_v8, %s2673_s10 }
0x15b4   :  { %v1875_v11 = vld [vmem:[#allocation1 + $0x1] ss:$4 sm:$0xff] }
0x15b5   :  { %1882 = vst.sshfl [vmem:[#allocation1] sm:$0xff pattern:$0x73625140] %v1799_v63  ;;  %1854 = vrot.lane.b32.xlu2 %v2393_v9, %s2674_s26  ;;  %v2395_v62 = vrot.slane %v1875_v11, 9 }
0x15bc   :  { %v1884_v34 = vld [vmem:[#allocation1 + $0x2] ss:$4 sm:$0xff] }
0x15bd   :  { %1887 = vst.sshfl [vmem:[#allocation1] sm:$0xff pattern:$0x73625140] %v1799_v63 }
0x15be   :  { %1886 = vst.msk [vmem:[#allocation2 + $0x3] sm:$0x1] %vm1800_vm4, %v1884_v34 }
0x15c4   :  { %v1889_v41 = vld [vmem:[#allocation1 + $0x2] ss:$4 sm:$0xff] }
0x15c5   :  { %v2396_v13 = vrot.slane %v1889_v41, 9  ;;  %1896 = vst.sshfl [vmem:[#allocation1] sm:$0xff pattern:$0x73625140] %v1799_v63 }
0x15c7   :  { %1892 = vrot.lane.b32.xlu1 %v2396_v13, %s2672_s9 }
0x15cc   :  { %v1898_v14 = vld [vmem:[#allocation1 + $0x3] ss:$4 sm:$0xff] }
0x15cd   :  { %1899 = vrot.lane.b32.xlu0 %v1898_v14, %s2673_s10  ;;  %1903 = vst.sshfl [vmem:[#allocation1] sm:$0xff pattern:$0x73625140] %v1799_v63 }
0x15d4   :  { %v1905_v15 = vld [vmem:[#allocation1 + $0x3] ss:$4 sm:$0xff] }
0x15d5   :  { %1878 = vrot.lane.b32.xlu0 %v2395_v62, %s2674_s26  ;;  %v2397_v17 = vrot.slane %v1905_v15, 9 }
0x15d7   :  { %1908 = vrot.lane.b32.xlu1 %v2397_v17, %s2674_s26 }
0x15d9   :  { %v1863_v35 = vpop.permute.xlu2 %1862 }
0x15da   :  { %1865 = vst.msk [vmem:[#allocation2 + $0x1] sm:$0x1] %vm1808_vm7, %v1863_v35 }
0x15e9   :  { %v1806_v18 = vpop.permute.xlu1 %1805 }
0x15ea   :  { %1809 = vst.msk [vmem:[#allocation2] sm:$0x1] %vm1808_vm7, %v1806_v18 }
0x15ef   :  { %v1814_v19 = vpop.permute.xlu0 %1813 }
0x15f0   :  { %1817 = vst.msk [vmem:[#allocation2] sm:$0x1] %vm1816_vm11, %v1814_v19 }
0x15f9   :  { %v1824_v20 = vpop.permute.xlu1 %1823 }
0x15fa   :  { %1827 = vst.msk [vmem:[#allocation2] sm:$0x1] %vm1826_vm8, %v1824_v20 }
0x1607   :  { %v1870_v21 = vpop.permute.xlu2 %1869 }
0x1608   :  { %1872 = vst.msk [vmem:[#allocation2 + $0x1] sm:$0x1] %vm1816_vm11, %v1870_v21 }
0x1609   :  { %v1839_v23 = vpop.permute.xlu0 %1838 }
0x160a   :  { %1841 = vst.msk [vmem:[#allocation2 + $0x2] sm:$0x1] %vm1808_vm7, %v1839_v23 }
0x160f   :  { %v1855_v25 = vpop.permute.xlu2 %1854  ;;  %v1846_v36 = vpop.permute.xlu1 %1845 }
0x1610   :  { %1848 = vst.msk [vmem:[#allocation2 + $0x2] sm:$0x1] %vm1816_vm11, %v1846_v36 }
0x1611   :  { %1857 = vst.msk [vmem:[#allocation2 + $0x2] sm:$0x1] %vm1826_vm8, %v1855_v25 }
0x1639   :  { %v1893_v38 = vpop.permute.xlu1 %1892 }
0x163a   :  { %1895 = vst.msk [vmem:[#allocation2 + $0x3] sm:$0x1] %vm1808_vm7, %v1893_v38 }
0x163f   :  { %v1900_v39 = vpop.permute.xlu0 %1899 }
0x1640   :  { %1902 = vst.msk [vmem:[#allocation2 + $0x3] sm:$0x1] %vm1816_vm11, %v1900_v39 }
0x1647   :  { %v1879_v53 = vpop.permute.xlu0 %1878 }
0x1648   :  { %1881 = vst.msk [vmem:[#allocation2 + $0x1] sm:$0x1] %vm1826_vm8, %v1879_v53 }
0x1649   :  { %v1909_v42 = vpop.permute.xlu1 %1908 }
0x164a   :  { %1911 = vst.msk [vmem:[#allocation2 + $0x3] sm:$0x1] %vm1826_vm8, %v1909_v42 }
0x1651   :  { %v1912_v43 = vld [vmem:[#allocation2] sm:$0xf] }
0x1652   :  { %1914 = vst [vmem:[#allocation1] ss:$4 sm:$0xff] %v1912_v43 }
0x1659   :  { %v1915_v44 = vld.sshfl [vmem:[#allocation1] sm:$0xff pattern:$0x73625140]  ;;  %v1916_v45 = vld.sshfl [vmem:[#allocation1 + $0x8] sm:$0xff pattern:$0x73625140] }
0x165a   :  { %v1919_v46 = vpack.c.bf16 %v1915_v44, %v1915_v44  ;;  %v1920_v48 = vpack.c.bf16 %v1916_v45, %v1916_v45 }
0x165c   :  { %2061 = vmatmul.bf16.vlgmr.msrb.gmra.mxu2 %v1919_v46  ;;  %2074 = vmatmul.bf16.vlgmr.msrb.gmra.mxu0 %v1920_v48 }
0x16d9   :  { %v2075_v50 = vpop.f32.mrf.mxu0 }
0x16df   :  { %v2062_v55 = vpop.f32.mrf.mxu2 }
0x16e0   :  { %v2063_v56 = vadd.f32 %v2546_v51, %v2062_v55 }
0x16e1   :  { %v2077_v58 = vpop.f32.mrf.mxu0 }
0x16e2   :  { %v2076_v59 = vadd.f32 %v2075_v50, %v2063_v56 }
0x16e4   :  { %v2079_v60 = vpack.c.bf16 %v2076_v59, %v2076_v59 }
0x16e6   :  { %2470 = vmatmul.msk.bf16.vlgmr.msra.gmra.mxu1 %vm59_vm0, %v2079_v60 }
0x16e7   :  { %v2064_v61 = vpop.f32.mrf.mxu2 }
0x1763   :  { %v2112_v63 = vpop.f32.mrf.mxu1 }
0x1764   :  { %v2113_v0 = vadd.f32 %v2547_v57, %v2112_v63 }
0x1766   :  { %2116 = vst [vmem:[#allocation3] sm:$0x3] %v2113_v0 }
0x1767   :  { %2127 = dma.vmem_to_hbm [thread:$0]  %s2123_s14, 32, %s2125_s22, [#allocation4]  }
0x176b   :  { %v2114_v1 = vpop.f32.mrf.mxu1 }
0x176c   :  { %2668 = dma.done.wait [#allocation4], 32  }
0x176d   :  { %2669 = vsyncadd [#allocation4], 4294967264 }
0x176e   :  { %2132 = vsyncpa [#allocation4], 1 }

</bundles_post_ra>
